<compile_context>
chip_gen: v7x
topology: tpu7x:2x2x1
jax: 0.10.0
libtpu: 0.0.40
codegen_flags: <defaults>
</compile_context>

<pallas_src>
import functools
import math

import numpy as np

import jax
import jax.numpy as jnp
from jax import lax
from jax.experimental import pallas as pl
from jax.experimental.pallas import tpu as pltpu


# ----------------------------------------------------------------------------
# Fused Pallas kernel: conv1 -> conv2 -> fc+LayerNorm -> fused double-Q MLP
# ----------------------------------------------------------------------------
def _critic_fused_kernel(x0_ref, extra_ref, w1_ref, w2_ref, wt_ref, vec_ref,
                         out_ref, *, feat, hp, r_q1, r_q2, r_q3):
    n1 = w1_ref.shape[1]                      # F * OH1 * OW1
    n2 = w2_ref.shape[1]                      # flat (padded to x8)

    def mm(x, w):
        # one plain 2-D MXU matmul; bf16 operands, f32 accumulation.
        return jnp.dot(x.astype(jnp.bfloat16), w,
                       preferred_element_type=jnp.float32)

    # conv1 (3x3, stride 2) + bias + ReLU  [obs/255 folded into the weights]
    h = jnp.maximum(mm(x0_ref[...], w1_ref[...]) + vec_ref[0:1, 0:n1], 0.0)
    # conv2 (3x3, stride 1) + bias + ReLU
    h = jnp.maximum(mm(h, w2_ref[...]) + vec_ref[1:2, 0:n2], 0.0)

    # encoder fc + LayerNorm (eps=1e-5, output_logits=True -> no tanh).
    # fc weight / bias are zero outside the first `feat` lanes, so zf there is 0.
    zf = mm(h, wt_ref[0:r_q1, :]) + vec_ref[2:3, 0:hp]        # (B, hp)
    zfeat = zf[:, 0:feat]
    mu = jnp.mean(zfeat, axis=-1, keepdims=True)
    var = jnp.mean(jnp.square(zfeat - mu), axis=-1, keepdims=True)
    # gamma/beta are zero outside the feature lanes -> LN output 0 there;
    # extra_ref carries [pose, t, action] pre-placed at lanes feat:feat+13.
    z = ((zf - mu) * lax.rsqrt(var + 1e-5) * vec_ref[3:4, 0:hp]
         + vec_ref[4:5, 0:hp] + extra_ref[...])

    # fused double-Q MLP: both heads side by side in lanes 0:2*hidden.
    h1 = jnp.maximum(mm(z, wt_ref[r_q1:r_q2, :]) + vec_ref[5:6, 0:hp], 0.0)
    h2 = jnp.maximum(mm(h1, wt_ref[r_q2:r_q3, :]) + vec_ref[6:7, 0:hp], 0.0)
    out_ref[...] = mm(h2, wt_ref[r_q3:r_q3 + hp, :]) + vec_ref[7:8, 0:hp]


# ----------------------------------------------------------------------------
# Wrapper: zero-cost obs reshape + tiny concat/pad, then the single fused call
# ----------------------------------------------------------------------------
def critic_forward(packed, obs, pose, t, action, *, feat):
    B = obs.shape[0]
    hp = packed["wt"].shape[1]                        # 128 (lane-padded head dim)
    x0 = obs.reshape(B, -1)                           # NCHW flatten (free)
    extra = jnp.concatenate([pose, t, action], axis=-1)
    extra = jnp.pad(extra, ((0, 0), (feat, hp - feat - extra.shape[1])))

    r_q1 = packed["w2"].shape[1]                      # fc rows end / Q1 rows start
    r_q2, r_q3 = r_q1 + hp, r_q1 + 2 * hp

    args = (x0, extra, packed["w1"], packed["w2"], packed["wt"], packed["vec"])

    def _full(a):
        nd = a.ndim
        return pl.BlockSpec(a.shape, lambda i, nd=nd: (0,) * nd)

    out = pl.pallas_call(
        functools.partial(_critic_fused_kernel, feat=feat, hp=hp,
                          r_q1=r_q1, r_q2=r_q2, r_q3=r_q3),
        out_shape=jax.ShapeDtypeStruct((B, hp), jnp.float32),
        grid=(1,),
        in_specs=[_full(a) for a in args],
        out_specs=pl.BlockSpec((B, hp), lambda i: (0, 0)),
        compiler_params=pltpu.CompilerParams(
            dimension_semantics=("arbitrary",)),
    )(*args)

    return out[:, 0:1], out[:, 1:2]


# ----------------------------------------------------------------------------
# Canonical parameters (mimicking weight_init)
# ----------------------------------------------------------------------------
def make_params(key, obs_shape, action_shape, hidden_dim, feature_dim,
                num_filters):
    C, H, W = obs_shape
    F = num_filters
    ortho = jax.nn.initializers.orthogonal()
    gain_relu = math.sqrt(2.0)
    keys = jax.random.split(key, 8)

    w1 = jnp.zeros((F, C, 3, 3), jnp.float32)
    w1 = w1.at[:, :, 1, 1].set(gain_relu * ortho(keys[0], (F, C), jnp.float32))
    w2 = jnp.zeros((F, F, 3, 3), jnp.float32)
    w2 = w2.at[:, :, 1, 1].set(gain_relu * ortho(keys[1], (F, F), jnp.float32))

    OH1, OW1 = (H - 3) // 2 + 1, (W - 3) // 2 + 1
    OH2, OW2 = OH1 - 2, OW1 - 2
    flat = F * OH2 * OW2
    in_dim = feature_dim + 1 + 2 * action_shape

    def q_params(k):
        ka, kb, kc = jax.random.split(k, 3)
        return dict(
            w1=ortho(ka, (in_dim, hidden_dim), jnp.float32),
            b1=jnp.zeros((1, hidden_dim), jnp.float32),
            w2=ortho(kb, (hidden_dim, hidden_dim), jnp.float32),
            b2=jnp.zeros((1, hidden_dim), jnp.float32),
            w3=ortho(kc, (hidden_dim, 1), jnp.float32),
            b3=jnp.zeros((1, 1), jnp.float32),
        )

    return dict(
        conv1_w_oihw=w1, conv1_b=jnp.zeros((1, F), jnp.float32),
        conv2_w_oihw=w2, conv2_b=jnp.zeros((1, F), jnp.float32),
        fc_w=ortho(keys[2], (flat, feature_dim), jnp.float32),
        fc_b=jnp.zeros((1, feature_dim), jnp.float32),
        ln_g=jnp.ones((1, feature_dim), jnp.float32),
        ln_b=jnp.zeros((1, feature_dim), jnp.float32),
        q1=q_params(keys[3]),
        q2=q_params(keys[4]),
    )


# ----------------------------------------------------------------------------
# Kernel-side packing: dense-unrolled convs, fused/padded Q slabs, bias slab
# ----------------------------------------------------------------------------
def pack_params(cp, obs_shape, hp=128):
    C, H, W = obs_shape
    F = int(cp["conv1_w_oihw"].shape[0])
    OH1, OW1 = (H - 3) // 2 + 1, (W - 3) // 2 + 1
    OH2, OW2 = OH1 - 2, OW1 - 2
    n1 = F * OH1 * OW1
    flat = F * OH2 * OW2
    flat_p = ((flat + 7) // 8) * 8            # keep tail-slab offsets x8 aligned
    feat = int(cp["fc_w"].shape[1])
    hid = int(cp["q1"]["w1"].shape[1])
    in_dim = int(cp["q1"]["w1"].shape[0])
    assert feat <= hp and 2 * hid <= hp and in_dim <= hp

    w1 = np.asarray(cp["conv1_w_oihw"], np.float32)
    w2 = np.asarray(cp["conv2_w_oihw"], np.float32)

    # conv1 as one dense (C*H*W, F*OH1*OW1) matmul; stride-2 window + /255 folded.
    W1d = np.zeros((C * H * W, n1), np.float32)
    fcols1 = np.arange(F) * (OH1 * OW1)
    for c in range(C):
        for kh in range(3):
            for kw in range(3):
                wv = w1[:, c, kh, kw] / 255.0
                for oh in range(OH1):
                    for ow in range(OW1):
                        row = c * H * W + (2 * oh + kh) * W + (2 * ow + kw)
                        W1d[row, fcols1 + oh * OW1 + ow] = wv

    # conv2 as one dense (n1, flat_p) matmul; output columns in torch NCHW
    # flatten order (f, oh, ow) so the canonical fc weight needs no permutation.
    W2d = np.zeros((n1, flat_p), np.float32)
    fcols2 = np.arange(F) * (OH2 * OW2)
    for fi in range(F):
        for kh in range(3):
            for kw in range(3):
                wv = w2[:, fi, kh, kw]
                for oh in range(OH2):
                    for ow in range(OW2):
                        row = fi * OH1 * OW1 + (oh + kh) * OW1 + (ow + kw)
                        W2d[row, fcols2 + oh * OW2 + ow] = wv

    # tail slab: [fc | Q-layer1 | Q-layer2 | Q-layer3], all lane-padded to hp.
    q1p, q2p = cp["q1"], cp["q2"]
    r_q1, r_q2, r_q3 = flat_p, flat_p + hp, flat_p + 2 * hp
    wt = np.zeros((flat_p + 3 * hp, hp), np.float32)
    wt[:flat, :feat] = np.asarray(cp["fc_w"], np.float32)
    wt[r_q1:r_q1 + in_dim, :2 * hid] = np.concatenate(
        [np.asarray(q1p["w1"], np.float32),
         np.asarray(q2p["w1"], np.float32)], axis=1)
    wt[r_q2:r_q2 + hid, :hid] = np.asarray(q1p["w2"], np.float32)
    wt[r_q2 + hid:r_q2 + 2 * hid, hid:2 * hid] = np.asarray(q2p["w2"], np.float32)
    wt[r_q3:r_q3 + hid, 0] = np.asarray(q1p["w3"], np.float32).reshape(hid)
    wt[r_q3 + hid:r_q3 + 2 * hid, 1] = np.asarray(q2p["w3"], np.float32).reshape(hid)

    # per-channel vector slab (f32): conv/fc/Q biases + LN gamma/beta.
    vw = max(n1, hp)
    vec = np.zeros((8, vw), np.float32)
    vec[0, :n1] = np.repeat(np.asarray(cp["conv1_b"], np.float32).reshape(F),
                            OH1 * OW1)
    vec[1, :flat] = np.repeat(np.asarray(cp["conv2_b"], np.float32).reshape(F),
                              OH2 * OW2)
    vec[2, :feat] = np.asarray(cp["fc_b"], np.float32).reshape(feat)
    vec[3, :feat] = np.asarray(cp["ln_g"], np.float32).reshape(feat)
    vec[4, :feat] = np.asarray(cp["ln_b"], np.float32).reshape(feat)
    vec[5, :2 * hid] = np.concatenate(
        [np.asarray(q1p["b1"], np.float32).reshape(hid),
         np.asarray(q2p["b1"], np.float32).reshape(hid)])
    vec[6, :2 * hid] = np.concatenate(
        [np.asarray(q1p["b2"], np.float32).reshape(hid),
         np.asarray(q2p["b2"], np.float32).reshape(hid)])
    vec[7, 0] = float(np.asarray(q1p["b3"]).reshape(()))
    vec[7, 1] = float(np.asarray(q2p["b3"]).reshape(()))

    return dict(w1=jnp.asarray(W1d, jnp.bfloat16),
                w2=jnp.asarray(W2d, jnp.bfloat16),
                wt=jnp.asarray(wt, jnp.bfloat16),
                vec=jnp.asarray(vec, jnp.float32))


# ----------------------------------------------------------------------------
# Pure-JAX reference (canonical parameters)
# ----------------------------------------------------------------------------
def reference_forward(params, obs, pose, t, action):
    x = obs / 255.0
    dn = ("NCHW", "OIHW", "NCHW")
    y = lax.conv_general_dilated(x, params["conv1_w_oihw"], (2, 2), "VALID",
                                 dimension_numbers=dn)
    y = jax.nn.relu(y + params["conv1_b"].reshape(1, -1, 1, 1))
    y = lax.conv_general_dilated(y, params["conv2_w_oihw"], (1, 1), "VALID",
                                 dimension_numbers=dn)
    y = jax.nn.relu(y + params["conv2_b"].reshape(1, -1, 1, 1))
    h = y.reshape(y.shape[0], -1)
    zf = h @ params["fc_w"] + params["fc_b"]
    mu = zf.mean(-1, keepdims=True)
    var = ((zf - mu) ** 2).mean(-1, keepdims=True)
    z_i = (zf - mu) / jnp.sqrt(var + 1e-5) * params["ln_g"] + params["ln_b"]
    z = jnp.concatenate([z_i, pose, t, action], axis=-1)

    def q(p):
        h1 = jax.nn.relu(z @ p["w1"] + p["b1"])
        h2 = jax.nn.relu(h1 @ p["w2"] + p["b2"])
        return h2 @ p["w3"] + p["b3"]

    return q(params["q1"]), q(params["q2"])


# ----------------------------------------------------------------------------
if __name__ == "__main__":
    B = 2
    obs_shape = (4, 16, 16)        # (C, H, W)
    action_shape = 6
    hidden_dim = 32
    encoder_feature_dim = 32
    num_filters = 8

    key = jax.random.PRNGKey(0)
    pkey, okey, posekey, tkey, akey = jax.random.split(key, 5)

    params = make_params(pkey, obs_shape, action_shape, hidden_dim,
                         encoder_feature_dim, num_filters)
    packed = pack_params(params, obs_shape)

    obs = jax.random.uniform(okey, (B,) + obs_shape, jnp.float32, 0.0, 255.0)
    pose = jax.random.normal(posekey, (B, action_shape), jnp.float32)
    t = jax.random.uniform(tkey, (B, 1), jnp.float32)
    action = jax.random.normal(akey, (B, action_shape), jnp.float32)

    fwd = jax.jit(functools.partial(critic_forward, feat=encoder_feature_dim))
    q1, q2 = fwd(packed, obs, pose, t, action)
    q1, q2 = jax.block_until_ready((q1, q2))
    assert q1.shape == (B, 1) and q2.shape == (B, 1)

    # (a) reference with the same bf16-rounded weights: isolates kernel structure.
    def _bf16_rt(x):
        return (x.astype(jnp.bfloat16).astype(jnp.float32)
                if x.dtype == jnp.float32 else x)
    params_bf = jax.tree_util.tree_map(_bf16_rt, params)
    rq1, rq2 = reference_forward(params_bf, obs, pose, t, action)
    assert jnp.allclose(q1, rq1, atol=2e-2, rtol=2e-2), (q1, rq1)
    assert jnp.allclose(q2, rq2, atol=2e-2, rtol=2e-2), (q2, rq2)

    # (b) full-precision reference: residual gap is bf16 MXU operand rounding.
    r1, r2 = reference_forward(params, obs, pose, t, action)
    assert jnp.allclose(q1, r1, atol=5e-2, rtol=5e-2), (q1, r1)
    assert jnp.allclose(q2, r2, atol=5e-2, rtol=5e-2), (q2, r2)

    print("KERNEL_OK")
</pallas_src>

<mosaic_0001>
module attributes {stable_mosaic.version = 11 : i64} {
  func.func @_critic_fused_kernel(%arg0: i32, %arg1: memref<2x1024xf32, #tpu.memory_space<vmem>>, %arg2: memref<2x128xf32, #tpu.memory_space<vmem>>, %arg3: memref<1024x392xbf16, #tpu.memory_space<vmem>>, %arg4: memref<392x200xbf16, #tpu.memory_space<vmem>>, %arg5: memref<584x128xbf16, #tpu.memory_space<vmem>>, %arg6: memref<8x392xf32, #tpu.memory_space<vmem>>, %arg7: memref<2x128xf32, #tpu.memory_space<vmem>>) attributes {dimension_semantics = [#tpu.dimension_semantics<arbitrary>], iteration_bounds = array<i64: 1>, scalar_prefetch = 0 : i64, scratch_operands = 0 : i64, tpu.core_type = #tpu.core_type<tc>, window_params = [{pipeline_mode = #tpu.pipeline_mode<synchronous>, transform_indices = @transform_0, window_bounds = array<i64: 2, 1024>}, {pipeline_mode = #tpu.pipeline_mode<synchronous>, transform_indices = @transform_1, window_bounds = array<i64: 2, 128>}, {pipeline_mode = #tpu.pipeline_mode<synchronous>, transform_indices = @transform_2, window_bounds = array<i64: 1024, 392>}, {pipeline_mode = #tpu.pipeline_mode<synchronous>, transform_indices = @transform_3, window_bounds = array<i64: 392, 200>}, {pipeline_mode = #tpu.pipeline_mode<synchronous>, transform_indices = @transform_4, window_bounds = array<i64: 584, 128>}, {pipeline_mode = #tpu.pipeline_mode<synchronous>, transform_indices = @transform_5, window_bounds = array<i64: 8, 392>}, {pipeline_mode = #tpu.pipeline_mode<synchronous>, transform_indices = @transform_6, window_bounds = array<i64: 2, 128>}]} {
    %c0 = arith.constant 0 : index
    %c0_0 = arith.constant 0 : index
    %0 = vector.load %arg1[%c0, %c0_0] : memref<2x1024xf32, #tpu.memory_space<vmem>>, vector<2x1024xf32>
    %c0_1 = arith.constant 0 : index
    %c0_2 = arith.constant 0 : index
    %1 = vector.load %arg3[%c0_1, %c0_2] : memref<1024x392xbf16, #tpu.memory_space<vmem>>, vector<1024x392xbf16>
    %2 = arith.truncf %0 : vector<2x1024xf32> to vector<2x1024xbf16>
    %cst = arith.constant dense<0.000000e+00> : vector<2x392xf32>
    %3 = tpu.matmul %2, %1, %cst {dimension_numbers = #tpu.dot_dimension_numbers<[1], [0], [0], [1], [0, 0, 1, 1], [], []>} : vector<2x1024xbf16>, vector<1024x392xbf16>, vector<2x392xf32> -> vector<2x392xf32>
    %c0_3 = arith.constant 0 : index
    %c0_4 = arith.constant 0 : index
    %4 = vector.load %arg6[%c0_3, %c0_4] : memref<8x392xf32, #tpu.memory_space<vmem>>, vector<1x392xf32>
    %5 = vector.broadcast %4 : vector<1x392xf32> to vector<2x392xf32>
    %6 = arith.addf %3, %5 : vector<2x392xf32>
    %cst_5 = arith.constant 0.000000e+00 : f32
    %7 = vector.broadcast %cst_5 : f32 to vector<2x392xf32>
    %8 = arith.maximumf %6, %7 : vector<2x392xf32>
    %c0_6 = arith.constant 0 : index
    %c0_7 = arith.constant 0 : index
    %9 = vector.load %arg4[%c0_6, %c0_7] : memref<392x200xbf16, #tpu.memory_space<vmem>>, vector<392x200xbf16>
    %10 = arith.truncf %8 : vector<2x392xf32> to vector<2x392xbf16>
    %cst_8 = arith.constant dense<0.000000e+00> : vector<2x200xf32>
    %11 = tpu.matmul %10, %9, %cst_8 {dimension_numbers = #tpu.dot_dimension_numbers<[1], [0], [0], [1], [0, 0, 1, 1], [], []>} : vector<2x392xbf16>, vector<392x200xbf16>, vector<2x200xf32> -> vector<2x200xf32>
    %c1 = arith.constant 1 : index
    %c0_9 = arith.constant 0 : index
    %12 = vector.load %arg6[%c1, %c0_9] : memref<8x392xf32, #tpu.memory_space<vmem>>, vector<1x200xf32>
    %13 = vector.broadcast %12 : vector<1x200xf32> to vector<2x200xf32>
    %14 = arith.addf %11, %13 : vector<2x200xf32>
    %cst_10 = arith.constant 0.000000e+00 : f32
    %15 = vector.broadcast %cst_10 : f32 to vector<2x200xf32>
    %16 = arith.maximumf %14, %15 : vector<2x200xf32>
    %c0_11 = arith.constant 0 : index
    %c0_12 = arith.constant 0 : index
    %17 = vector.load %arg5[%c0_11, %c0_12] : memref<584x128xbf16, #tpu.memory_space<vmem>>, vector<200x128xbf16>
    %18 = arith.truncf %16 : vector<2x200xf32> to vector<2x200xbf16>
    %cst_13 = arith.constant dense<0.000000e+00> : vector<2x128xf32>
    %19 = tpu.matmul %18, %17, %cst_13 {dimension_numbers = #tpu.dot_dimension_numbers<[1], [0], [0], [1], [0, 0, 1, 1], [], []>} : vector<2x200xbf16>, vector<200x128xbf16>, vector<2x128xf32> -> vector<2x128xf32>
    %c2 = arith.constant 2 : index
    %c0_14 = arith.constant 0 : index
    %20 = vector.load %arg6[%c2, %c0_14] : memref<8x392xf32, #tpu.memory_space<vmem>>, vector<1x128xf32>
    %21 = vector.broadcast %20 : vector<1x128xf32> to vector<2x128xf32>
    %22 = arith.addf %19, %21 : vector<2x128xf32>
    %23 = vector.extract_strided_slice %22 {offsets = [0, 0], sizes = [2, 32], strides = [1, 1]} : vector<2x128xf32> to vector<2x32xf32>
    %cst_15 = arith.constant dense<0.000000e+00> : vector<2xf32>
    %24 = vector.multi_reduction <add>, %23, %cst_15 [1] : vector<2x32xf32> to vector<2xf32>
    %25 = vector.shape_cast %24 : vector<2xf32> to vector<2x1xf32>
    %cst_16 = arith.constant 3.200000e+01 : f32
    %26 = vector.broadcast %cst_16 : f32 to vector<2x1xf32>
    %27 = arith.divf %25, %26 : vector<2x1xf32>
    %28 = vector.broadcast %27 : vector<2x1xf32> to vector<2x32xf32>
    %29 = arith.subf %23, %28 : vector<2x32xf32>
    %30 = arith.mulf %29, %29 : vector<2x32xf32>
    %cst_17 = arith.constant dense<0.000000e+00> : vector<2xf32>
    %31 = vector.multi_reduction <add>, %30, %cst_17 [1] : vector<2x32xf32> to vector<2xf32>
    %32 = vector.shape_cast %31 : vector<2xf32> to vector<2x1xf32>
    %cst_18 = arith.constant 3.200000e+01 : f32
    %33 = vector.broadcast %cst_18 : f32 to vector<2x1xf32>
    %34 = arith.divf %32, %33 : vector<2x1xf32>
    %35 = vector.broadcast %27 : vector<2x1xf32> to vector<2x128xf32>
    %36 = arith.subf %22, %35 : vector<2x128xf32>
    %cst_19 = arith.constant 9.99999974E-6 : f32
    %37 = vector.broadcast %cst_19 : f32 to vector<2x1xf32>
    %38 = arith.addf %34, %37 : vector<2x1xf32>
    %39 = math.rsqrt %38 : vector<2x1xf32>
    %40 = vector.broadcast %39 : vector<2x1xf32> to vector<2x128xf32>
    %41 = arith.mulf %36, %40 : vector<2x128xf32>
    %c3 = arith.constant 3 : index
    %c0_20 = arith.constant 0 : index
    %42 = vector.load %arg6[%c3, %c0_20] : memref<8x392xf32, #tpu.memory_space<vmem>>, vector<1x128xf32>
    %43 = vector.broadcast %42 : vector<1x128xf32> to vector<2x128xf32>
    %44 = arith.mulf %41, %43 : vector<2x128xf32>
    %c4 = arith.constant 4 : index
    %c0_21 = arith.constant 0 : index
    %45 = vector.load %arg6[%c4, %c0_21] : memref<8x392xf32, #tpu.memory_space<vmem>>, vector<1x128xf32>
    %46 = vector.broadcast %45 : vector<1x128xf32> to vector<2x128xf32>
    %47 = arith.addf %44, %46 : vector<2x128xf32>
    %c0_22 = arith.constant 0 : index
    %c0_23 = arith.constant 0 : index
    %48 = vector.load %arg2[%c0_22, %c0_23] : memref<2x128xf32, #tpu.memory_space<vmem>>, vector<2x128xf32>
    %49 = arith.addf %47, %48 : vector<2x128xf32>
    %c200 = arith.constant 200 : index
    %c0_24 = arith.constant 0 : index
    %50 = vector.load %arg5[%c200, %c0_24] : memref<584x128xbf16, #tpu.memory_space<vmem>>, vector<128x128xbf16>
    %51 = arith.truncf %49 : vector<2x128xf32> to vector<2x128xbf16>
    %cst_25 = arith.constant dense<0.000000e+00> : vector<2x128xf32>
    %52 = tpu.matmul %51, %50, %cst_25 {dimension_numbers = #tpu.dot_dimension_numbers<[1], [0], [0], [1], [0, 0, 1, 1], [], []>} : vector<2x128xbf16>, vector<128x128xbf16>, vector<2x128xf32> -> vector<2x128xf32>
    %c5 = arith.constant 5 : index
    %c0_26 = arith.constant 0 : index
    %53 = vector.load %arg6[%c5, %c0_26] : memref<8x392xf32, #tpu.memory_space<vmem>>, vector<1x128xf32>
    %54 = vector.broadcast %53 : vector<1x128xf32> to vector<2x128xf32>
    %55 = arith.addf %52, %54 : vector<2x128xf32>
    %cst_27 = arith.constant 0.000000e+00 : f32
    %56 = vector.broadcast %cst_27 : f32 to vector<2x128xf32>
    %57 = arith.maximumf %55, %56 : vector<2x128xf32>
    %c328 = arith.constant 328 : index
    %c0_28 = arith.constant 0 : index
    %58 = vector.load %arg5[%c328, %c0_28] : memref<584x128xbf16, #tpu.memory_space<vmem>>, vector<128x128xbf16>
    %59 = arith.truncf %57 : vector<2x128xf32> to vector<2x128xbf16>
    %cst_29 = arith.constant dense<0.000000e+00> : vector<2x128xf32>
    %60 = tpu.matmul %59, %58, %cst_29 {dimension_numbers = #tpu.dot_dimension_numbers<[1], [0], [0], [1], [0, 0, 1, 1], [], []>} : vector<2x128xbf16>, vector<128x128xbf16>, vector<2x128xf32> -> vector<2x128xf32>
    %c6 = arith.constant 6 : index
    %c0_30 = arith.constant 0 : index
    %61 = vector.load %arg6[%c6, %c0_30] : memref<8x392xf32, #tpu.memory_space<vmem>>, vector<1x128xf32>
    %62 = vector.broadcast %61 : vector<1x128xf32> to vector<2x128xf32>
    %63 = arith.addf %60, %62 : vector<2x128xf32>
    %cst_31 = arith.constant 0.000000e+00 : f32
    %64 = vector.broadcast %cst_31 : f32 to vector<2x128xf32>
    %65 = arith.maximumf %63, %64 : vector<2x128xf32>
    %c456 = arith.constant 456 : index
    %c0_32 = arith.constant 0 : index
    %66 = vector.load %arg5[%c456, %c0_32] : memref<584x128xbf16, #tpu.memory_space<vmem>>, vector<128x128xbf16>
    %67 = arith.truncf %65 : vector<2x128xf32> to vector<2x128xbf16>
    %cst_33 = arith.constant dense<0.000000e+00> : vector<2x128xf32>
    %68 = tpu.matmul %67, %66, %cst_33 {dimension_numbers = #tpu.dot_dimension_numbers<[1], [0], [0], [1], [0, 0, 1, 1], [], []>} : vector<2x128xbf16>, vector<128x128xbf16>, vector<2x128xf32> -> vector<2x128xf32>
    %c7 = arith.constant 7 : index
    %c0_34 = arith.constant 0 : index
    %69 = vector.load %arg6[%c7, %c0_34] : memref<8x392xf32, #tpu.memory_space<vmem>>, vector<1x128xf32>
    %70 = vector.broadcast %69 : vector<1x128xf32> to vector<2x128xf32>
    %71 = arith.addf %68, %70 : vector<2x128xf32>
    %c0_35 = arith.constant 0 : index
    %c0_36 = arith.constant 0 : index
    %72 = vector.load %arg7[%c0_35, %c0_36] : memref<2x128xf32, #tpu.memory_space<vmem>>, vector<2x128xf32>
    tpu.vector_store %arg7[%c0_35, %c0_36], %71 {strides = array<i32>} : memref<2x128xf32, #tpu.memory_space<vmem>>, vector<2x128xf32>,
    return
  }
  func.func @transform_0(%arg0: i32) -> (i32, i32) {
    %c0_i32 = arith.constant 0 : i32
    %c0_i32_0 = arith.constant 0 : i32
    %c0_i32_1 = arith.constant 0 : i32
    return %c0_i32, %c0_i32_0 : i32, i32
  }
  func.func @transform_1(%arg0: i32) -> (i32, i32) {
    %c0_i32 = arith.constant 0 : i32
    %c0_i32_0 = arith.constant 0 : i32
    %c0_i32_1 = arith.constant 0 : i32
    return %c0_i32, %c0_i32_0 : i32, i32
  }
  func.func @transform_2(%arg0: i32) -> (i32, i32) {
    %c0_i32 = arith.constant 0 : i32
    %c0_i32_0 = arith.constant 0 : i32
    %c0_i32_1 = arith.constant 0 : i32
    return %c0_i32, %c0_i32_0 : i32, i32
  }
  func.func @transform_3(%arg0: i32) -> (i32, i32) {
    %c0_i32 = arith.constant 0 : i32
    %c0_i32_0 = arith.constant 0 : i32
    %c0_i32_1 = arith.constant 0 : i32
    return %c0_i32, %c0_i32_0 : i32, i32
  }
  func.func @transform_4(%arg0: i32) -> (i32, i32) {
    %c0_i32 = arith.constant 0 : i32
    %c0_i32_0 = arith.constant 0 : i32
    %c0_i32_1 = arith.constant 0 : i32
    return %c0_i32, %c0_i32_0 : i32, i32
  }
  func.func @transform_5(%arg0: i32) -> (i32, i32) {
    %c0_i32 = arith.constant 0 : i32
    %c0_i32_0 = arith.constant 0 : i32
    %c0_i32_1 = arith.constant 0 : i32
    return %c0_i32, %c0_i32_0 : i32, i32
  }
  func.func @transform_6(%arg0: i32) -> (i32, i32) {
    %c0_i32 = arith.constant 0 : i32
    %c0_i32_0 = arith.constant 0 : i32
    %c0_i32_1 = arith.constant 0 : i32
    return %c0_i32, %c0_i32_0 : i32, i32
  }
}

</mosaic_0001>

<bundles_post_ra>
// kernel: critic_forward.1
= control target key start
LH: loop header
LB: loop body
LE: loop exit
PB: predicated region body
PF: predicated region fallthrough
CT: control target
= control target key end

     0   :  { %v3841_v36 = vmov 1983009808   ;;  %v288_v38 = vlaneseq  ;;  %vm2279_vm0 = vcmask 64512   ;;  %vm2283_vm1 = vcmask 1043456   ;;  %s5031_s2 = inlined_call_operand.vmem [shape: bf16[1024,392], index: 2, kind: input, shape index: {}]   ;;  %s5032_s0 = inlined_call_operand.vmem [shape: f32[2,1024], index: 0, kind: input, shape index: {}]   ;;  %s5033_s3 = inlined_call_operand.vmem [shape: bf16[392,200], index: 3, kind: input, shape index: {}]   ;;  %s5034_s4 = inlined_call_operand.vmem [shape: bf16[584,128], index: 4, kind: input, shape index: {}]   ;;  %s5035_s5 = inlined_call_operand.vmem [shape: f32[8,392], index: 5, kind: input, shape index: {}]   ;;  %s5036_s1 = inlined_call_operand.vmem [shape: f32[2,128], index: 1, kind: input, shape index: {}]   ;;  %s5037_s6 = inlined_call_operand.vmem [shape: f32[2,128], index: 6, kind: output, shape index: {}]  }
   0x1   :  { %v3342_v0 = vld [vmem:[%s5031_s2 + $0x4] ss:$16 sps:$4 sm:$0xff]   ;;  %v3344_v1 = vld [vmem:[%s5031_s2 + $0xc] ss:$16 sps:$4 sm:$0xff]   ;;  %v3346_v2 = vld [vmem:[%s5031_s2] ss:$16 sps:$4 sm:$0xff]   ;;  %v286_v37 = vunpack.c.l.s4 %v3841_v36 }
   0x2   :  { %1636 = vmatprep.subr.bf16.mxu0 %v3342_v0  ;;  %v3347_v3 = vld [vmem:[%s5031_s2 + $0x8] ss:$16 sps:$4 sm:$0xff]   ;;  %1800 = vmatprep.subr.bf16.mxu1 %v3344_v1  ;;  %v3348_v4 = vld [vmem:[%s5031_s2 + $0x24] ss:$16 sps:$4 sm:$0xff]   ;;  %v3350_v5 = vld [vmem:[%s5031_s2 + $0x2c] ss:$16 sps:$4 sm:$0xff]  }
   0x3   :  { %1637 = vmatpush1.bf16.msra.mxu0 %v3346_v2  ;;  %1801 = vmatpush1.bf16.msra.mxu1 %v3347_v3  ;;  %v3352_v6 = vld [vmem:[%s5031_s2 + $0x20] ss:$16 sps:$4 sm:$0xff]   ;;  %v3353_v7 = vld [vmem:[%s5031_s2 + $0x28] ss:$16 sps:$4 sm:$0xff]   ;;  %v3354_v8 = vld [vmem:[%s5031_s2 + $0x44] ss:$16 sps:$4 sm:$0xff]   ;;  %v287_v42 = vunpack.c.0.s8 %v286_v37 }
   0x4   :  { %1638 = vmatprep.subr.bf16.mxu0 %v3348_v4  ;;  %1802 = vmatprep.subr.bf16.mxu1 %v3350_v5  ;;  %v3356_v9 = vld [vmem:[%s5031_s2 + $0x4c] ss:$16 sps:$4 sm:$0xff]   ;;  %v3358_v10 = vld [vmem:[%s5031_s2 + $0x40] ss:$16 sps:$4 sm:$0xff]   ;;  %v3359_v11 = vld [vmem:[%s5031_s2 + $0x48] ss:$16 sps:$4 sm:$0xff]  }
   0x5   :  { %v3360_v12 = vld [vmem:[%s5031_s2 + $0x64] ss:$16 sps:$4 sm:$0xff]   ;;  %v3362_v13 = vld [vmem:[%s5031_s2 + $0x6c] ss:$16 sps:$4 sm:$0xff]   ;;  %v3364_v14 = vld [vmem:[%s5031_s2 + $0x60] ss:$16 sps:$4 sm:$0xff]  }
   0x6   :  { %v3365_v15 = vld [vmem:[%s5031_s2 + $0x68] ss:$16 sps:$4 sm:$0xff]   ;;  %v3366_v16 = vld [vmem:[%s5031_s2 + $0x84] ss:$16 sps:$4 sm:$0xff]   ;;  %v3368_v17 = vld [vmem:[%s5031_s2 + $0x8c] ss:$16 sps:$4 sm:$0xff]  }
   0x7   :  { %1639 = vmatpush1.bf16.msra.mxu0 %v3352_v6  ;;  %1803 = vmatpush1.bf16.msra.mxu1 %v3353_v7  ;;  %v3370_v18 = vld [vmem:[%s5031_s2 + $0x80] ss:$16 sps:$4 sm:$0xff]   ;;  %v3371_v19 = vld [vmem:[%s5031_s2 + $0x88] ss:$16 sps:$4 sm:$0xff]   ;;  %v3372_v20 = vld [vmem:[%s5031_s2 + $0xa4] ss:$16 sps:$4 sm:$0xff]  }
   0x8   :  { %1640 = vmatprep.subr.bf16.mxu0 %v3354_v8  ;;  %1804 = vmatprep.subr.bf16.mxu1 %v3356_v9  ;;  %v3374_v21 = vld [vmem:[%s5031_s2 + $0xac] ss:$16 sps:$4 sm:$0xff]   ;;  %v3376_v22 = vld [vmem:[%s5031_s2 + $0xa0] ss:$16 sps:$4 sm:$0xff]   ;;  %v3377_v23 = vld [vmem:[%s5031_s2 + $0xa8] ss:$16 sps:$4 sm:$0xff]  }
   0x9   :  { %v3378_v24 = vld [vmem:[%s5031_s2 + $0xc4] ss:$16 sps:$4 sm:$0xff]   ;;  %v3380_v25 = vld [vmem:[%s5031_s2 + $0xcc] ss:$16 sps:$4 sm:$0xff]   ;;  %v3382_v26 = vld [vmem:[%s5031_s2 + $0xc0] ss:$16 sps:$4 sm:$0xff]  }
   0xa   :  { %v3383_v27 = vld [vmem:[%s5031_s2 + $0xc8] ss:$16 sps:$4 sm:$0xff]   ;;  %v3384_v28 = vld [vmem:[%s5031_s2 + $0xe4] ss:$16 sps:$4 sm:$0xff]   ;;  %v3386_v29 = vld [vmem:[%s5031_s2 + $0xec] ss:$16 sps:$4 sm:$0xff]  }
   0xb   :  { %1641 = vmatpush1.bf16.msra.mxu0 %v3358_v10  ;;  %1805 = vmatpush1.bf16.msra.mxu1 %v3359_v11  ;;  %v3388_v30 = vld [vmem:[%s5031_s2 + $0xe0] ss:$16 sps:$4 sm:$0xff]   ;;  %v3389_v31 = vld [vmem:[%s5031_s2 + $0xe8] ss:$16 sps:$4 sm:$0xff]   ;;  %v3390_v32 = vld [vmem:[%s5031_s2 + $0x104] ss:$16 sps:$4 sm:$0xff]  }
   0xc   :  { %1642 = vmatprep.subr.bf16.mxu0 %v3360_v12  ;;  %1806 = vmatprep.subr.bf16.mxu1 %v3362_v13  ;;  %v3392_v33 = vld [vmem:[%s5031_s2 + $0x10c] ss:$16 sps:$4 sm:$0xff]   ;;  %v3394_v34 = vld [vmem:[%s5031_s2 + $0x100] ss:$16 sps:$4 sm:$0xff]   ;;  %v3395_v35 = vld [vmem:[%s5031_s2 + $0x108] ss:$16 sps:$4 sm:$0xff]  }
   0xd   :  { %v3396_v39 = vld [vmem:[%s5031_s2 + $0x124] ss:$16 sps:$4 sm:$0xff]   ;;  %v3398_v40 = vld [vmem:[%s5031_s2 + $0x12c] ss:$16 sps:$4 sm:$0xff]   ;;  %v3400_v41 = vld [vmem:[%s5031_s2 + $0x120] ss:$16 sps:$4 sm:$0xff]  }
   0xe   :  { %v3997_v43 = vshrl.u32 %v288_v38, 7  ;;  %v3401_v44 = vld [vmem:[%s5031_s2 + $0x128] ss:$16 sps:$4 sm:$0xff]   ;;  %v3402_v45 = vld [vmem:[%s5031_s2 + $0x144] ss:$16 sps:$4 sm:$0xff]   ;;  %vm2477_vm2 = vcmask 588800  }
   0xf   :  { %1643 = vmatpush1.bf16.msra.mxu0 %v3364_v14  ;;  %1807 = vmatpush1.bf16.msra.mxu1 %v3365_v15  ;;  %v3404_v46 = vld [vmem:[%s5031_s2 + $0x14c] ss:$16 sps:$4 sm:$0xff]   ;;  %v3406_v47 = vld [vmem:[%s5031_s2 + $0x140] ss:$16 sps:$4 sm:$0xff]   ;;  %v3407_v48 = vld [vmem:[%s5031_s2 + $0x148] ss:$16 sps:$4 sm:$0xff]  }
  0x10   :  { %1644 = vmatprep.subr.bf16.mxu0 %v3366_v16  ;;  %1808 = vmatprep.subr.bf16.mxu1 %v3368_v17  ;;  %v4015_v49 = vsub.s32 %v287_v42, %v3997_v43  ;;  %v3408_v50 = vld [vmem:[%s5031_s2 + $0x164] ss:$16 sps:$4 sm:$0xff]   ;;  %v3410_v51 = vld [vmem:[%s5031_s2 + $0x16c] ss:$16 sps:$4 sm:$0xff]   ;;  %v3412_v54 = vld [vmem:[%s5031_s2 + $0x160] ss:$16 sps:$4 sm:$0xff]  }
  0x11   :  { %v24_v52 = vld [vmem:[%s5032_s0] sm:$0xff]  ;;  %v3413_v55 = vld [vmem:[%s5031_s2 + $0x168] ss:$16 sps:$4 sm:$0xff]   ;;  %v3416_v57 = vld [vmem:[%s5031_s2 + $0x18c] ss:$16 sps:$4 sm:$0xff]   ;;  %vm2524_vm3 = vcmask 254976  }
  0x12   :  { %v291_v53 = vrot.slane %v24_v52, %v4015_v49  ;;  %v3414_v56 = vld [vmem:[%s5031_s2 + $0x184] ss:$16 sps:$4 sm:$0xff]   ;;  %v3418_v60 = vld [vmem:[%s5031_s2 + $0x180] ss:$16 sps:$4 sm:$0xff]   ;;  %v3419_v61 = vld [vmem:[%s5031_s2 + $0x188] ss:$16 sps:$4 sm:$0xff]   ;;  %v284_v4 = vcombine.high %v24_v52, %v24_v52 }
  0x13   :  { %1645 = vmatpush1.bf16.msra.mxu0 %v3370_v18  ;;  %1809 = vmatpush1.bf16.msra.mxu1 %v3371_v19  ;;  %v3420_v62 = vld [vmem:[%s5031_s2 + $0x1a4] ss:$16 sps:$4 sm:$0xff]   ;;  %v3422_v63 = vld [vmem:[%s5031_s2 + $0x1ac] ss:$16 sps:$4 sm:$0xff]   ;;  %v3424_v0 = vld [vmem:[%s5031_s2 + $0x1a0] ss:$16 sps:$4 sm:$0xff]  }
  0x14   :  { %1646 = vmatprep.subr.bf16.mxu0 %v3372_v20  ;;  %1810 = vmatprep.subr.bf16.mxu1 %v3374_v21  ;;  %v299_v58 = vcombine.high %v291_v53, %v291_v53  ;;  %v3425_v1 = vld [vmem:[%s5031_s2 + $0x1a8] ss:$16 sps:$4 sm:$0xff]   ;;  %v3426_v2 = vld [vmem:[%s5031_s2 + $0x1c4] ss:$16 sps:$4 sm:$0xff]   ;;  %v3428_v3 = vld [vmem:[%s5031_s2 + $0x1cc] ss:$16 sps:$4 sm:$0xff]   ;;  %v4076_v9 = vrot.slane %v284_v4, %v4015_v49  ;;  %v326_v15 = vpack.c.bf16 %v291_v53, %v291_v53 }
  0x15   :  { %v3430_v5 = vld [vmem:[%s5031_s2 + $0x1c0] ss:$16 sps:$4 sm:$0xff]   ;;  %v3431_v6 = vld [vmem:[%s5031_s2 + $0x1c8] ss:$16 sps:$4 sm:$0xff]   ;;  %v3432_v7 = vld [vmem:[%s5031_s2 + $0x1e4] ss:$16 sps:$4 sm:$0xff]  }
  0x16   :  { %v327_v59 = vpack.c.bf16 %v299_v58, %v299_v58  ;;  %v3434_v8 = vld [vmem:[%s5031_s2 + $0x1ec] ss:$16 sps:$4 sm:$0xff]   ;;  %v3436_v10 = vld [vmem:[%s5031_s2 + $0x1e0] ss:$16 sps:$4 sm:$0xff]   ;;  %v3437_v11 = vld [vmem:[%s5031_s2 + $0x1e8] ss:$16 sps:$4 sm:$0xff]   ;;  %v300_v14 = vcombine.high %v4076_v9, %v4076_v9 }
  0x17   :  { %1647 = vmatpush1.bf16.msra.mxu0 %v3376_v22  ;;  %1811 = vmatpush1.bf16.msra.mxu1 %v3377_v23  ;;  %v3442_v12 = vld [vmem:[%s5031_s2 + $0x204] ss:$16 sps:$4 sm:$0xff]   ;;  %v3445_v13 = vld [vmem:[%s5031_s2 + $0x20c] ss:$16 sps:$4 sm:$0xff]   ;;  %v3440_v16 = vld [vmem:[%s5031_s2 + $0x200] ss:$16 sps:$4 sm:$0xff]  }
  0x18   :  { %1648 = vmatprep.subr.bf16.mxu0 %v3378_v24  ;;  %1812 = vmatprep.subr.bf16.mxu1 %v3380_v25  ;;  %v3443_v17 = vld [vmem:[%s5031_s2 + $0x208] ss:$16 sps:$4 sm:$0xff]   ;;  %v3448_v18 = vld [vmem:[%s5031_s2 + $0x224] ss:$16 sps:$4 sm:$0xff]   ;;  %v3451_v19 = vld [vmem:[%s5031_s2 + $0x22c] ss:$16 sps:$4 sm:$0xff]   ;;  %v329_v20 = vpack.c.bf16 %v300_v14, %v300_v14 }
  0x19   :  { %1668 = vmatprep.mubr.bf16.mxu0 %v327_v59  ;;  %1832 = vmatprep.mubr.bf16.mxu1 %v327_v59  ;;  %v3446_v21 = vld [vmem:[%s5031_s2 + $0x220] ss:$16 sps:$4 sm:$0xff]   ;;  %v3449_v22 = vld [vmem:[%s5031_s2 + $0x228] ss:$16 sps:$4 sm:$0xff]   ;;  %v3454_v23 = vld [vmem:[%s5031_s2 + $0x244] ss:$16 sps:$4 sm:$0xff]  }
  0x1a   :  { %v3457_v24 = vld [vmem:[%s5031_s2 + $0x24c] ss:$16 sps:$4 sm:$0xff]   ;;  %v3452_v25 = vld [vmem:[%s5031_s2 + $0x240] ss:$16 sps:$4 sm:$0xff]   ;;  %v3473_v38 = vld [vmem:[%s5031_s2 + $0x2a8] ss:$16 sps:$4 sm:$0xff]  }
  0x1b   :  { %1649 = vmatpush1.bf16.msra.mxu0 %v3382_v26  ;;  %1813 = vmatpush1.bf16.msra.mxu1 %v3383_v27  ;;  %v3455_v26 = vld [vmem:[%s5031_s2 + $0x248] ss:$16 sps:$4 sm:$0xff]   ;;  %v3460_v27 = vld [vmem:[%s5031_s2 + $0x264] ss:$16 sps:$4 sm:$0xff]   ;;  %v3475_v36 = vld [vmem:[%s5031_s2 + $0x2ac] ss:$16 sps:$4 sm:$0xff]  }
  0x1c   :  { %1650 = vmatprep.subr.bf16.mxu0 %v3384_v28  ;;  %1814 = vmatprep.subr.bf16.mxu1 %v3386_v29  ;;  %v3463_v28 = vld [vmem:[%s5031_s2 + $0x26c] ss:$16 sps:$4 sm:$0xff]   ;;  %v3458_v29 = vld [vmem:[%s5031_s2 + $0x260] ss:$16 sps:$4 sm:$0xff]   ;;  %v3479_v42 = vld [vmem:[%s5031_s2 + $0x2c8] ss:$16 sps:$4 sm:$0xff]  }
  0x1d   :  { %v3470_v37 = vld [vmem:[%s5031_s2 + $0x2a0] ss:$16 sps:$4 sm:$0xff]   ;;  %v3491_v52 = vld [vmem:[%s5031_s2 + $0x308] ss:$16 sps:$4 sm:$0xff]   ;;  %v3496_v53 = vld [vmem:[%s5031_s2 + $0x324] ss:$16 sps:$4 sm:$0xff]  }
  0x1e   :  { %v3505_v58 = vld [vmem:[%s5031_s2 + $0x34c] ss:$16 sps:$4 sm:$0xff]   ;;  %v3500_v59 = vld [vmem:[%s5031_s2 + $0x340] ss:$16 sps:$4 sm:$0xff]   ;;  %v3515_v4 = vld [vmem:[%s5031_s2 + $0x388] ss:$16 sps:$4 sm:$0xff]  }
  0x1f   :  { %1651 = vmatpush1.bf16.msra.mxu0 %v3388_v30  ;;  %1815 = vmatpush1.bf16.msra.mxu1 %v3389_v31  ;;  %v3461_v30 = vld [vmem:[%s5031_s2 + $0x268] ss:$16 sps:$4 sm:$0xff]   ;;  %v3466_v31 = vld [vmem:[%s5031_s2 + $0x284] ss:$16 sps:$4 sm:$0xff]   ;;  %vm3844_vm4 = vmmov 0  }
  0x20   :  { %1652 = vmatprep.subr.bf16.mxu0 %v3390_v32  ;;  %1816 = vmatprep.subr.bf16.mxu1 %v3392_v33  ;;  %v3469_v32 = vld [vmem:[%s5031_s2 + $0x28c] ss:$16 sps:$4 sm:$0xff]   ;;  %v3464_v33 = vld [vmem:[%s5031_s2 + $0x280] ss:$16 sps:$4 sm:$0xff]   ;;  %v3527_v14 = vld [vmem:[%s5031_s2 + $0x3c8] ss:$16 sps:$4 sm:$0xff]  }
  0x23   :  { %1653 = vmatpush1.bf16.msra.mxu0 %v3394_v34  ;;  %1817 = vmatpush1.bf16.msra.mxu1 %v3395_v35  ;;  %v3467_v34 = vld [vmem:[%s5031_s2 + $0x288] ss:$16 sps:$4 sm:$0xff]   ;;  %v3472_v35 = vld [vmem:[%s5031_s2 + $0x2a4] ss:$16 sps:$4 sm:$0xff]  }
  0x24   :  { %1654 = vmatprep.subr.bf16.mxu0 %v3396_v39  ;;  %1818 = vmatprep.subr.bf16.mxu1 %v3398_v40  ;;  %v3478_v39 = vld [vmem:[%s5031_s2 + $0x2c4] ss:$16 sps:$4 sm:$0xff]   ;;  %v3481_v40 = vld [vmem:[%s5031_s2 + $0x2cc] ss:$16 sps:$4 sm:$0xff]  }
  0x27   :  { %1655 = vmatpush1.bf16.msra.mxu0 %v3400_v41  ;;  %1819 = vmatpush1.bf16.msra.mxu1 %v3401_v44  ;;  %v3476_v41 = vld [vmem:[%s5031_s2 + $0x2c0] ss:$16 sps:$4 sm:$0xff]   ;;  %v3484_v44 = vld [vmem:[%s5031_s2 + $0x2e4] ss:$16 sps:$4 sm:$0xff]  }
  0x28   :  { %1656 = vmatprep.subr.bf16.mxu0 %v3402_v45  ;;  %1820 = vmatprep.subr.bf16.mxu1 %v3404_v46  ;;  %v3487_v45 = vld [vmem:[%s5031_s2 + $0x2ec] ss:$16 sps:$4 sm:$0xff]   ;;  %v3482_v46 = vld [vmem:[%s5031_s2 + $0x2e0] ss:$16 sps:$4 sm:$0xff]  }
  0x2b   :  { %1657 = vmatpush1.bf16.msra.mxu0 %v3406_v47  ;;  %1821 = vmatpush1.bf16.msra.mxu1 %v3407_v48  ;;  %v3485_v47 = vld [vmem:[%s5031_s2 + $0x2e8] ss:$16 sps:$4 sm:$0xff]   ;;  %v3490_v48 = vld [vmem:[%s5031_s2 + $0x304] ss:$16 sps:$4 sm:$0xff]  }
  0x2c   :  { %1658 = vmatprep.subr.bf16.mxu0 %v3408_v50  ;;  %1822 = vmatprep.subr.bf16.mxu1 %v3410_v51  ;;  %v3493_v50 = vld [vmem:[%s5031_s2 + $0x30c] ss:$16 sps:$4 sm:$0xff]   ;;  %v3488_v51 = vld [vmem:[%s5031_s2 + $0x300] ss:$16 sps:$4 sm:$0xff]  }
  0x2f   :  { %1659 = vmatpush1.bf16.msra.mxu0 %v3412_v54  ;;  %1823 = vmatpush1.bf16.msra.mxu1 %v3413_v55  ;;  %v3499_v54 = vld [vmem:[%s5031_s2 + $0x32c] ss:$16 sps:$4 sm:$0xff]   ;;  %v3494_v55 = vld [vmem:[%s5031_s2 + $0x320] ss:$16 sps:$4 sm:$0xff]  }
  0x30   :  { %1660 = vmatprep.subr.bf16.mxu0 %v3414_v56  ;;  %1824 = vmatprep.subr.bf16.mxu1 %v3416_v57  ;;  %v3497_v56 = vld [vmem:[%s5031_s2 + $0x328] ss:$16 sps:$4 sm:$0xff]   ;;  %v3502_v57 = vld [vmem:[%s5031_s2 + $0x344] ss:$16 sps:$4 sm:$0xff]  }
  0x33   :  { %1661 = vmatpush1.bf16.msra.mxu0 %v3418_v60  ;;  %1825 = vmatpush1.bf16.msra.mxu1 %v3419_v61  ;;  %v3503_v60 = vld [vmem:[%s5031_s2 + $0x348] ss:$16 sps:$4 sm:$0xff]   ;;  %v3508_v61 = vld [vmem:[%s5031_s2 + $0x364] ss:$16 sps:$4 sm:$0xff]  }
  0x34   :  { %1662 = vmatprep.subr.bf16.mxu0 %v3420_v62  ;;  %1826 = vmatprep.subr.bf16.mxu1 %v3422_v63  ;;  %v3511_v62 = vld [vmem:[%s5031_s2 + $0x36c] ss:$16 sps:$4 sm:$0xff]   ;;  %v3506_v63 = vld [vmem:[%s5031_s2 + $0x360] ss:$16 sps:$4 sm:$0xff]  }
  0x37   :  { %1663 = vmatpush1.bf16.msra.mxu0 %v3424_v0  ;;  %1827 = vmatpush1.bf16.msra.mxu1 %v3425_v1  ;;  %v3509_v0 = vld [vmem:[%s5031_s2 + $0x368] ss:$16 sps:$4 sm:$0xff]   ;;  %v3514_v1 = vld [vmem:[%s5031_s2 + $0x384] ss:$16 sps:$4 sm:$0xff]  }
  0x38   :  { %1664 = vmatprep.subr.bf16.mxu0 %v3426_v2  ;;  %1828 = vmatprep.subr.bf16.mxu1 %v3428_v3  ;;  %v3517_v2 = vld [vmem:[%s5031_s2 + $0x38c] ss:$16 sps:$4 sm:$0xff]   ;;  %v3512_v3 = vld [vmem:[%s5031_s2 + $0x380] ss:$16 sps:$4 sm:$0xff]  }
  0x3b   :  { %1665 = vmatpush1.bf16.msra.mxu0 %v3430_v5  ;;  %1829 = vmatpush1.bf16.msra.mxu1 %v3431_v6  ;;  %v3520_v5 = vld [vmem:[%s5031_s2 + $0x3a4] ss:$16 sps:$4 sm:$0xff]   ;;  %v3523_v6 = vld [vmem:[%s5031_s2 + $0x3ac] ss:$16 sps:$4 sm:$0xff]  }
  0x3c   :  { %1666 = vmatprep.subr.bf16.mxu0 %v3432_v7  ;;  %1830 = vmatprep.subr.bf16.mxu1 %v3434_v8  ;;  %v3518_v7 = vld [vmem:[%s5031_s2 + $0x3a0] ss:$16 sps:$4 sm:$0xff]   ;;  %v3521_v8 = vld [vmem:[%s5031_s2 + $0x3a8] ss:$16 sps:$4 sm:$0xff]  }
  0x3f   :  { %1667 = vmatpush1.bf16.msra.mxu0 %v3436_v10  ;;  %1831 = vmatpush1.bf16.msra.mxu1 %v3437_v11  ;;  %v3526_v10 = vld [vmem:[%s5031_s2 + $0x3c4] ss:$16 sps:$4 sm:$0xff]   ;;  %v3529_v11 = vld [vmem:[%s5031_s2 + $0x3cc] ss:$16 sps:$4 sm:$0xff]  }
  0x40   :  { %1677 = vmatprep.subr.bf16.mxu0 %v3442_v12  ;;  %1841 = vmatprep.subr.bf16.mxu1 %v3445_v13  ;;  %v4263_v12 = vld [vmem:[%s5032_s0 + $0x8] sm:$0xff]  ;;  %v3524_v13 = vld [vmem:[%s5031_s2 + $0x3c0] ss:$16 sps:$4 sm:$0xff]  }
  0x42   :  { %1669 = vmatmul.mubr.bf16.vlgmr.msra.gmra.mrb[0].mxu0 %v326_v15  ;;  %1833 = vmatmul.mubr.bf16.vlgmr.msra.gmra.mrb[0].mxu1 %v326_v15  ;;  %v3532_v15 = vld [vmem:[%s5031_s2 + $0x3e4] ss:$16 sps:$4 sm:$0xff]  }
  0x43   :  { %1678 = vmatpush1.bf16.msra.mxu0 %v3440_v16  ;;  %1842 = vmatpush1.bf16.msra.mxu1 %v3443_v17  ;;  %v3535_v16 = vld [vmem:[%s5031_s2 + $0x3ec] ss:$16 sps:$4 sm:$0xff]   ;;  %v4279_v17 = vrot.slane %v4263_v12, %v4015_v49 }
  0x44   :  { %1679 = vmatprep.subr.bf16.mxu0 %v3448_v18  ;;  %1843 = vmatprep.subr.bf16.mxu1 %v3451_v19  ;;  %v3530_v18 = vld [vmem:[%s5031_s2 + $0x3e0] ss:$16 sps:$4 sm:$0xff]   ;;  %v3533_v19 = vld [vmem:[%s5031_s2 + $0x3e8] ss:$16 sps:$4 sm:$0xff]  }
  0x45   :  { %1709 = vmatprep.mubr.bf16.mxu0 %v329_v20  ;;  %1873 = vmatprep.mubr.bf16.mxu1 %v329_v20  ;;  %v3538_v20 = vld [vmem:[%s5031_s2 + $0x404] ss:$16 sps:$4 sm:$0xff]  }
  0x47   :  { %1680 = vmatpush1.bf16.msra.mxu0 %v3446_v21  ;;  %1844 = vmatpush1.bf16.msra.mxu1 %v3449_v22  ;;  %v3541_v21 = vld [vmem:[%s5031_s2 + $0x40c] ss:$16 sps:$4 sm:$0xff]   ;;  %v316_v22 = vcombine.high %v4279_v17, %v4279_v17 }
  0x48   :  { %1681 = vmatprep.subr.bf16.mxu0 %v3454_v23  ;;  %1845 = vmatprep.subr.bf16.mxu1 %v3457_v24  ;;  %v328_v23 = vpack.c.bf16 %v4076_v9, %v4076_v9  ;;  %v3536_v24 = vld [vmem:[%s5031_s2 + $0x400] ss:$16 sps:$4 sm:$0xff]   ;;  %v3547_v9 = vld [vmem:[%s5031_s2 + $0x42c] ss:$16 sps:$4 sm:$0xff]  }
  0x4b   :  { %1682 = vmatpush1.bf16.msra.mxu0 %v3452_v25  ;;  %1846 = vmatpush1.bf16.msra.mxu1 %v3455_v26  ;;  %v3539_v25 = vld [vmem:[%s5031_s2 + $0x408] ss:$16 sps:$4 sm:$0xff]   ;;  %v3544_v26 = vld [vmem:[%s5031_s2 + $0x424] ss:$16 sps:$4 sm:$0xff]  }
  0x4c   :  { %1683 = vmatprep.subr.bf16.mxu0 %v3460_v27  ;;  %1847 = vmatprep.subr.bf16.mxu1 %v3463_v28  ;;  %v331_v27 = vpack.c.bf16 %v316_v22, %v316_v22  ;;  %v3542_v28 = vld [vmem:[%s5031_s2 + $0x420] ss:$16 sps:$4 sm:$0xff]  }
  0x4d   :  { %v3620_v22 = vld [vmem:[%s5031_s2 + $0x5c0] ss:$16 sps:$4 sm:$0xff]  }
  0x4f   :  { %1684 = vmatpush1.bf16.msra.mxu0 %v3458_v29  ;;  %1848 = vmatpush1.bf16.msra.mxu1 %v3461_v30  ;;  %v3545_v29 = vld [vmem:[%s5031_s2 + $0x428] ss:$16 sps:$4 sm:$0xff]   ;;  %v3550_v30 = vld [vmem:[%s5031_s2 + $0x444] ss:$16 sps:$4 sm:$0xff]  }
  0x50   :  { %1685 = vmatprep.subr.bf16.mxu0 %v3466_v31  ;;  %1849 = vmatprep.subr.bf16.mxu1 %v3469_v32  ;;  %v3553_v31 = vld [vmem:[%s5031_s2 + $0x44c] ss:$16 sps:$4 sm:$0xff]   ;;  %v3548_v32 = vld [vmem:[%s5031_s2 + $0x440] ss:$16 sps:$4 sm:$0xff]  }
  0x53   :  { %1686 = vmatpush1.bf16.msra.mxu0 %v3464_v33  ;;  %1850 = vmatpush1.bf16.msra.mxu1 %v3467_v34  ;;  %v3551_v33 = vld [vmem:[%s5031_s2 + $0x448] ss:$16 sps:$4 sm:$0xff]   ;;  %v3556_v34 = vld [vmem:[%s5031_s2 + $0x464] ss:$16 sps:$4 sm:$0xff]  }
  0x54   :  { %1687 = vmatprep.subr.bf16.mxu0 %v3472_v35  ;;  %1851 = vmatprep.subr.bf16.mxu1 %v3475_v36  ;;  %v3559_v35 = vld [vmem:[%s5031_s2 + $0x46c] ss:$16 sps:$4 sm:$0xff]   ;;  %v3554_v36 = vld [vmem:[%s5031_s2 + $0x460] ss:$16 sps:$4 sm:$0xff]  }
  0x57   :  { %1688 = vmatpush1.bf16.msra.mxu0 %v3470_v37  ;;  %1852 = vmatpush1.bf16.msra.mxu1 %v3473_v38  ;;  %v3557_v37 = vld [vmem:[%s5031_s2 + $0x468] ss:$16 sps:$4 sm:$0xff]   ;;  %v3562_v38 = vld [vmem:[%s5031_s2 + $0x484] ss:$16 sps:$4 sm:$0xff]  }
  0x58   :  { %1689 = vmatprep.subr.bf16.mxu0 %v3478_v39  ;;  %1853 = vmatprep.subr.bf16.mxu1 %v3481_v40  ;;  %v3565_v39 = vld [vmem:[%s5031_s2 + $0x48c] ss:$16 sps:$4 sm:$0xff]   ;;  %v3560_v40 = vld [vmem:[%s5031_s2 + $0x480] ss:$16 sps:$4 sm:$0xff]  }
  0x5b   :  { %1690 = vmatpush1.bf16.msra.mxu0 %v3476_v41  ;;  %1854 = vmatpush1.bf16.msra.mxu1 %v3479_v42  ;;  %v3563_v41 = vld [vmem:[%s5031_s2 + $0x488] ss:$16 sps:$4 sm:$0xff]   ;;  %v3568_v42 = vld [vmem:[%s5031_s2 + $0x4a4] ss:$16 sps:$4 sm:$0xff]  }
  0x5c   :  { %1691 = vmatprep.subr.bf16.mxu0 %v3484_v44  ;;  %1855 = vmatprep.subr.bf16.mxu1 %v3487_v45  ;;  %v3571_v44 = vld [vmem:[%s5031_s2 + $0x4ac] ss:$16 sps:$4 sm:$0xff]   ;;  %v3566_v45 = vld [vmem:[%s5031_s2 + $0x4a0] ss:$16 sps:$4 sm:$0xff]  }
  0x5f   :  { %1692 = vmatpush1.bf16.msra.mxu0 %v3482_v46  ;;  %1856 = vmatpush1.bf16.msra.mxu1 %v3485_v47  ;;  %v3569_v46 = vld [vmem:[%s5031_s2 + $0x4a8] ss:$16 sps:$4 sm:$0xff]   ;;  %v3574_v47 = vld [vmem:[%s5031_s2 + $0x4c4] ss:$16 sps:$4 sm:$0xff]  }
  0x60   :  { %1693 = vmatprep.subr.bf16.mxu0 %v3490_v48  ;;  %1857 = vmatprep.subr.bf16.mxu1 %v3493_v50  ;;  %v3577_v48 = vld [vmem:[%s5031_s2 + $0x4cc] ss:$16 sps:$4 sm:$0xff]   ;;  %v3572_v50 = vld [vmem:[%s5031_s2 + $0x4c0] ss:$16 sps:$4 sm:$0xff]  }
  0x63   :  { %1694 = vmatpush1.bf16.msra.mxu0 %v3488_v51  ;;  %1858 = vmatpush1.bf16.msra.mxu1 %v3491_v52  ;;  %v3575_v51 = vld [vmem:[%s5031_s2 + $0x4c8] ss:$16 sps:$4 sm:$0xff]   ;;  %v3580_v52 = vld [vmem:[%s5031_s2 + $0x4e4] ss:$16 sps:$4 sm:$0xff]  }
  0x64   :  { %1695 = vmatprep.subr.bf16.mxu0 %v3496_v53  ;;  %1859 = vmatprep.subr.bf16.mxu1 %v3499_v54  ;;  %v3583_v53 = vld [vmem:[%s5031_s2 + $0x4ec] ss:$16 sps:$4 sm:$0xff]   ;;  %v3578_v54 = vld [vmem:[%s5031_s2 + $0x4e0] ss:$16 sps:$4 sm:$0xff]  }
  0x67   :  { %1696 = vmatpush1.bf16.msra.mxu0 %v3494_v55  ;;  %1860 = vmatpush1.bf16.msra.mxu1 %v3497_v56  ;;  %v3581_v55 = vld [vmem:[%s5031_s2 + $0x4e8] ss:$16 sps:$4 sm:$0xff]   ;;  %v3586_v56 = vld [vmem:[%s5031_s2 + $0x504] ss:$16 sps:$4 sm:$0xff]  }
  0x68   :  { %1697 = vmatprep.subr.bf16.mxu0 %v3502_v57  ;;  %1861 = vmatprep.subr.bf16.mxu1 %v3505_v58  ;;  %v3589_v57 = vld [vmem:[%s5031_s2 + $0x50c] ss:$16 sps:$4 sm:$0xff]   ;;  %v3584_v58 = vld [vmem:[%s5031_s2 + $0x500] ss:$16 sps:$4 sm:$0xff]  }
  0x6b   :  { %1698 = vmatpush1.bf16.msra.mxu0 %v3500_v59  ;;  %1862 = vmatpush1.bf16.msra.mxu1 %v3503_v60  ;;  %v3587_v59 = vld [vmem:[%s5031_s2 + $0x508] ss:$16 sps:$4 sm:$0xff]   ;;  %v3592_v60 = vld [vmem:[%s5031_s2 + $0x524] ss:$16 sps:$4 sm:$0xff]  }
  0x6c   :  { %1699 = vmatprep.subr.bf16.mxu0 %v3508_v61  ;;  %1863 = vmatprep.subr.bf16.mxu1 %v3511_v62  ;;  %v3595_v61 = vld [vmem:[%s5031_s2 + $0x52c] ss:$16 sps:$4 sm:$0xff]   ;;  %v3590_v62 = vld [vmem:[%s5031_s2 + $0x520] ss:$16 sps:$4 sm:$0xff]  }
  0x6f   :  { %1700 = vmatpush1.bf16.msra.mxu0 %v3506_v63  ;;  %1864 = vmatpush1.bf16.msra.mxu1 %v3509_v0  ;;  %v3593_v63 = vld [vmem:[%s5031_s2 + $0x528] ss:$16 sps:$4 sm:$0xff]   ;;  %v3598_v0 = vld [vmem:[%s5031_s2 + $0x544] ss:$16 sps:$4 sm:$0xff]  }
  0x70   :  { %1701 = vmatprep.subr.bf16.mxu0 %v3514_v1  ;;  %1865 = vmatprep.subr.bf16.mxu1 %v3517_v2  ;;  %v3601_v1 = vld [vmem:[%s5031_s2 + $0x54c] ss:$16 sps:$4 sm:$0xff]   ;;  %v3596_v2 = vld [vmem:[%s5031_s2 + $0x540] ss:$16 sps:$4 sm:$0xff]  }
  0x73   :  { %1702 = vmatpush1.bf16.msra.mxu0 %v3512_v3  ;;  %1866 = vmatpush1.bf16.msra.mxu1 %v3515_v4  ;;  %v3599_v3 = vld [vmem:[%s5031_s2 + $0x548] ss:$16 sps:$4 sm:$0xff]   ;;  %v3604_v4 = vld [vmem:[%s5031_s2 + $0x564] ss:$16 sps:$4 sm:$0xff]  }
  0x74   :  { %1703 = vmatprep.subr.bf16.mxu0 %v3520_v5  ;;  %1867 = vmatprep.subr.bf16.mxu1 %v3523_v6  ;;  %v3607_v5 = vld [vmem:[%s5031_s2 + $0x56c] ss:$16 sps:$4 sm:$0xff]   ;;  %v3602_v6 = vld [vmem:[%s5031_s2 + $0x560] ss:$16 sps:$4 sm:$0xff]  }
  0x77   :  { %1704 = vmatpush1.bf16.msra.mxu0 %v3518_v7  ;;  %1868 = vmatpush1.bf16.msra.mxu1 %v3521_v8  ;;  %v3605_v7 = vld [vmem:[%s5031_s2 + $0x568] ss:$16 sps:$4 sm:$0xff]   ;;  %v3610_v8 = vld [vmem:[%s5031_s2 + $0x584] ss:$16 sps:$4 sm:$0xff]  }
  0x78   :  { %1705 = vmatprep.subr.bf16.mxu0 %v3526_v10  ;;  %1869 = vmatprep.subr.bf16.mxu1 %v3529_v11  ;;  %v3613_v10 = vld [vmem:[%s5031_s2 + $0x58c] ss:$16 sps:$4 sm:$0xff]   ;;  %v3608_v11 = vld [vmem:[%s5031_s2 + $0x580] ss:$16 sps:$4 sm:$0xff]  }
  0x7b   :  { %1706 = vmatpush1.bf16.msra.mxu0 %v3524_v13  ;;  %1870 = vmatpush1.bf16.msra.mxu1 %v3527_v14  ;;  %v3611_v13 = vld [vmem:[%s5031_s2 + $0x588] ss:$16 sps:$4 sm:$0xff]   ;;  %v3616_v14 = vld [vmem:[%s5031_s2 + $0x5a4] ss:$16 sps:$4 sm:$0xff]  }
  0x7c   :  { %1707 = vmatprep.subr.bf16.mxu0 %v3532_v15  ;;  %1871 = vmatprep.subr.bf16.mxu1 %v3535_v16  ;;  %v3619_v15 = vld [vmem:[%s5031_s2 + $0x5ac] ss:$16 sps:$4 sm:$0xff]   ;;  %v3614_v16 = vld [vmem:[%s5031_s2 + $0x5a0] ss:$16 sps:$4 sm:$0xff]  }
  0x7f   :  { %1708 = vmatpush1.bf16.msra.mxu0 %v3530_v18  ;;  %1872 = vmatpush1.bf16.msra.mxu1 %v3533_v19  ;;  %v3617_v18 = vld [vmem:[%s5031_s2 + $0x5a8] ss:$16 sps:$4 sm:$0xff]   ;;  %v3622_v19 = vld [vmem:[%s5031_s2 + $0x5c4] ss:$16 sps:$4 sm:$0xff]  }
  0x80   :  { %1718 = vmatprep.subr.bf16.mxu0 %v3538_v20  ;;  %1882 = vmatprep.subr.bf16.mxu1 %v3541_v21  ;;  %v3625_v20 = vld [vmem:[%s5031_s2 + $0x5cc] ss:$16 sps:$4 sm:$0xff]   ;;  %v301_v21 = vcombine.high %v4263_v12, %v4263_v12 }
  0x81   :  { %v3631_v12 = vld [vmem:[%s5031_s2 + $0x5ec] ss:$16 sps:$4 sm:$0xff]  }
  0x82   :  { %1710 = vmatmul.mubr.bf16.vlgmr.msra.gmra.mrb[0].mxu0 %v328_v23  ;;  %1874 = vmatmul.mubr.bf16.vlgmr.msra.gmra.mrb[0].mxu1 %v328_v23  ;;  %v3623_v23 = vld [vmem:[%s5031_s2 + $0x5c8] ss:$16 sps:$4 sm:$0xff]  }
  0x83   :  { %1719 = vmatpush1.bf16.msra.mxu0 %v3536_v24  ;;  %1883 = vmatpush1.bf16.msra.mxu1 %v3539_v25  ;;  %v3628_v24 = vld [vmem:[%s5031_s2 + $0x5e4] ss:$16 sps:$4 sm:$0xff]   ;;  %v4480_v25 = vrot.slane %v301_v21, %v4015_v49  ;;  %v3637_v49 = vld [vmem:[%s5031_s2 + $0x60c] ss:$16 sps:$4 sm:$0xff]  }
  0x84   :  { %1720 = vmatprep.subr.bf16.mxu0 %v3544_v26  ;;  %1884 = vmatprep.subr.bf16.mxu1 %v3547_v9  ;;  %v3626_v26 = vld [vmem:[%s5031_s2 + $0x5e0] ss:$16 sps:$4 sm:$0xff]   ;;  %v3629_v9 = vld [vmem:[%s5031_s2 + $0x5e8] ss:$16 sps:$4 sm:$0xff]   ;;  %v3712_v21 = vld [vmem:[%s5031_s2 + $0x7a4] ss:$16 sps:$4 sm:$0xff]  }
  0x85   :  { %1750 = vmatprep.mubr.bf16.mxu0 %v331_v27  ;;  %1914 = vmatprep.mubr.bf16.mxu1 %v331_v27  ;;  %v3634_v27 = vld [vmem:[%s5031_s2 + $0x604] ss:$16 sps:$4 sm:$0xff]  }
  0x87   :  { %1721 = vmatpush1.bf16.msra.mxu0 %v3542_v28  ;;  %1885 = vmatpush1.bf16.msra.mxu1 %v3545_v29  ;;  %v3632_v28 = vld [vmem:[%s5031_s2 + $0x600] ss:$16 sps:$4 sm:$0xff]   ;;  %v3635_v29 = vld [vmem:[%s5031_s2 + $0x608] ss:$16 sps:$4 sm:$0xff]  }
  0x88   :  { %1722 = vmatprep.subr.bf16.mxu0 %v3550_v30  ;;  %1886 = vmatprep.subr.bf16.mxu1 %v3553_v31  ;;  %v317_v30 = vcombine.high %v4480_v25, %v4480_v25  ;;  %v330_v31 = vpack.c.bf16 %v4279_v17, %v4279_v17  ;;  %v3641_v17 = vld [vmem:[%s5031_s2 + $0x628] ss:$16 sps:$4 sm:$0xff]  }
  0x8b   :  { %1723 = vmatpush1.bf16.msra.mxu0 %v3548_v32  ;;  %1887 = vmatpush1.bf16.msra.mxu1 %v3551_v33  ;;  %v3640_v32 = vld [vmem:[%s5031_s2 + $0x624] ss:$16 sps:$4 sm:$0xff]   ;;  %v3643_v33 = vld [vmem:[%s5031_s2 + $0x62c] ss:$16 sps:$4 sm:$0xff]  }
  0x8c   :  { %1724 = vmatprep.subr.bf16.mxu0 %v3556_v34  ;;  %1888 = vmatprep.subr.bf16.mxu1 %v3559_v35  ;;  %v3638_v34 = vld [vmem:[%s5031_s2 + $0x620] ss:$16 sps:$4 sm:$0xff]   ;;  %v333_v35 = vpack.c.bf16 %v317_v30, %v317_v30  ;;  %v3725_v30 = vld [vmem:[%s5031_s2 + $0x7e8] ss:$16 sps:$4 sm:$0xff]  }
  0x8f   :  { %1725 = vmatpush1.bf16.msra.mxu0 %v3554_v36  ;;  %1889 = vmatpush1.bf16.msra.mxu1 %v3557_v37  ;;  %v3646_v36 = vld [vmem:[%s5031_s2 + $0x644] ss:$16 sps:$4 sm:$0xff]   ;;  %v3649_v37 = vld [vmem:[%s5031_s2 + $0x64c] ss:$16 sps:$4 sm:$0xff]  }
  0x90   :  { %1726 = vmatprep.subr.bf16.mxu0 %v3562_v38  ;;  %1890 = vmatprep.subr.bf16.mxu1 %v3565_v39  ;;  %v3644_v38 = vld [vmem:[%s5031_s2 + $0x640] ss:$16 sps:$4 sm:$0xff]   ;;  %v3647_v39 = vld [vmem:[%s5031_s2 + $0x648] ss:$16 sps:$4 sm:$0xff]  }
  0x93   :  { %1727 = vmatpush1.bf16.msra.mxu0 %v3560_v40  ;;  %1891 = vmatpush1.bf16.msra.mxu1 %v3563_v41  ;;  %v3652_v40 = vld [vmem:[%s5031_s2 + $0x664] ss:$16 sps:$4 sm:$0xff]   ;;  %v3655_v41 = vld [vmem:[%s5031_s2 + $0x66c] ss:$16 sps:$4 sm:$0xff]  }
  0x94   :  { %1728 = vmatprep.subr.bf16.mxu0 %v3568_v42  ;;  %1892 = vmatprep.subr.bf16.mxu1 %v3571_v44  ;;  %v3650_v42 = vld [vmem:[%s5031_s2 + $0x660] ss:$16 sps:$4 sm:$0xff]   ;;  %v3653_v44 = vld [vmem:[%s5031_s2 + $0x668] ss:$16 sps:$4 sm:$0xff]  }
  0x97   :  { %1729 = vmatpush1.bf16.msra.mxu0 %v3566_v45  ;;  %1893 = vmatpush1.bf16.msra.mxu1 %v3569_v46  ;;  %v3658_v45 = vld [vmem:[%s5031_s2 + $0x684] ss:$16 sps:$4 sm:$0xff]   ;;  %v3661_v46 = vld [vmem:[%s5031_s2 + $0x68c] ss:$16 sps:$4 sm:$0xff]  }
  0x98   :  { %1730 = vmatprep.subr.bf16.mxu0 %v3574_v47  ;;  %1894 = vmatprep.subr.bf16.mxu1 %v3577_v48  ;;  %v3656_v47 = vld [vmem:[%s5031_s2 + $0x680] ss:$16 sps:$4 sm:$0xff]   ;;  %v3659_v48 = vld [vmem:[%s5031_s2 + $0x688] ss:$16 sps:$4 sm:$0xff]  }
  0x9b   :  { %1731 = vmatpush1.bf16.msra.mxu0 %v3572_v50  ;;  %1895 = vmatpush1.bf16.msra.mxu1 %v3575_v51  ;;  %v3664_v50 = vld [vmem:[%s5031_s2 + $0x6a4] ss:$16 sps:$4 sm:$0xff]   ;;  %v3667_v51 = vld [vmem:[%s5031_s2 + $0x6ac] ss:$16 sps:$4 sm:$0xff]  }
  0x9c   :  { %1732 = vmatprep.subr.bf16.mxu0 %v3580_v52  ;;  %1896 = vmatprep.subr.bf16.mxu1 %v3583_v53  ;;  %v3662_v52 = vld [vmem:[%s5031_s2 + $0x6a0] ss:$16 sps:$4 sm:$0xff]   ;;  %v3665_v53 = vld [vmem:[%s5031_s2 + $0x6a8] ss:$16 sps:$4 sm:$0xff]  }
  0x9f   :  { %1733 = vmatpush1.bf16.msra.mxu0 %v3578_v54  ;;  %1897 = vmatpush1.bf16.msra.mxu1 %v3581_v55  ;;  %v3670_v54 = vld [vmem:[%s5031_s2 + $0x6c4] ss:$16 sps:$4 sm:$0xff]   ;;  %v3673_v55 = vld [vmem:[%s5031_s2 + $0x6cc] ss:$16 sps:$4 sm:$0xff]  }
  0xa0   :  { %1734 = vmatprep.subr.bf16.mxu0 %v3586_v56  ;;  %1898 = vmatprep.subr.bf16.mxu1 %v3589_v57  ;;  %v3668_v56 = vld [vmem:[%s5031_s2 + $0x6c0] ss:$16 sps:$4 sm:$0xff]   ;;  %v3671_v57 = vld [vmem:[%s5031_s2 + $0x6c8] ss:$16 sps:$4 sm:$0xff]  }
  0xa3   :  { %1735 = vmatpush1.bf16.msra.mxu0 %v3584_v58  ;;  %1899 = vmatpush1.bf16.msra.mxu1 %v3587_v59  ;;  %v3676_v58 = vld [vmem:[%s5031_s2 + $0x6e4] ss:$16 sps:$4 sm:$0xff]   ;;  %v3679_v59 = vld [vmem:[%s5031_s2 + $0x6ec] ss:$16 sps:$4 sm:$0xff]  }
  0xa4   :  { %1736 = vmatprep.subr.bf16.mxu0 %v3592_v60  ;;  %1900 = vmatprep.subr.bf16.mxu1 %v3595_v61  ;;  %v3674_v60 = vld [vmem:[%s5031_s2 + $0x6e0] ss:$16 sps:$4 sm:$0xff]   ;;  %v3677_v61 = vld [vmem:[%s5031_s2 + $0x6e8] ss:$16 sps:$4 sm:$0xff]  }
  0xa7   :  { %1737 = vmatpush1.bf16.msra.mxu0 %v3590_v62  ;;  %1901 = vmatpush1.bf16.msra.mxu1 %v3593_v63  ;;  %v3682_v62 = vld [vmem:[%s5031_s2 + $0x704] ss:$16 sps:$4 sm:$0xff]   ;;  %v3685_v63 = vld [vmem:[%s5031_s2 + $0x70c] ss:$16 sps:$4 sm:$0xff]  }
  0xa8   :  { %1738 = vmatprep.subr.bf16.mxu0 %v3598_v0  ;;  %1902 = vmatprep.subr.bf16.mxu1 %v3601_v1  ;;  %v3680_v0 = vld [vmem:[%s5031_s2 + $0x700] ss:$16 sps:$4 sm:$0xff]   ;;  %v3683_v1 = vld [vmem:[%s5031_s2 + $0x708] ss:$16 sps:$4 sm:$0xff]  }
  0xab   :  { %1739 = vmatpush1.bf16.msra.mxu0 %v3596_v2  ;;  %1903 = vmatpush1.bf16.msra.mxu1 %v3599_v3  ;;  %v3688_v2 = vld [vmem:[%s5031_s2 + $0x724] ss:$16 sps:$4 sm:$0xff]   ;;  %v3691_v3 = vld [vmem:[%s5031_s2 + $0x72c] ss:$16 sps:$4 sm:$0xff]  }
  0xac   :  { %1740 = vmatprep.subr.bf16.mxu0 %v3604_v4  ;;  %1904 = vmatprep.subr.bf16.mxu1 %v3607_v5  ;;  %v3686_v4 = vld [vmem:[%s5031_s2 + $0x720] ss:$16 sps:$4 sm:$0xff]   ;;  %v3689_v5 = vld [vmem:[%s5031_s2 + $0x728] ss:$16 sps:$4 sm:$0xff]  }
  0xaf   :  { %1741 = vmatpush1.bf16.msra.mxu0 %v3602_v6  ;;  %1905 = vmatpush1.bf16.msra.mxu1 %v3605_v7  ;;  %v3694_v6 = vld [vmem:[%s5031_s2 + $0x744] ss:$16 sps:$4 sm:$0xff]   ;;  %v3697_v7 = vld [vmem:[%s5031_s2 + $0x74c] ss:$16 sps:$4 sm:$0xff]  }
  0xb0   :  { %1742 = vmatprep.subr.bf16.mxu0 %v3610_v8  ;;  %1906 = vmatprep.subr.bf16.mxu1 %v3613_v10  ;;  %v3692_v8 = vld [vmem:[%s5031_s2 + $0x740] ss:$16 sps:$4 sm:$0xff]   ;;  %v3695_v10 = vld [vmem:[%s5031_s2 + $0x748] ss:$16 sps:$4 sm:$0xff]  }
  0xb3   :  { %1743 = vmatpush1.bf16.msra.mxu0 %v3608_v11  ;;  %1907 = vmatpush1.bf16.msra.mxu1 %v3611_v13  ;;  %v3700_v11 = vld [vmem:[%s5031_s2 + $0x764] ss:$16 sps:$4 sm:$0xff]   ;;  %v3703_v13 = vld [vmem:[%s5031_s2 + $0x76c] ss:$16 sps:$4 sm:$0xff]  }
  0xb4   :  { %1744 = vmatprep.subr.bf16.mxu0 %v3616_v14  ;;  %1908 = vmatprep.subr.bf16.mxu1 %v3619_v15  ;;  %v3698_v14 = vld [vmem:[%s5031_s2 + $0x760] ss:$16 sps:$4 sm:$0xff]   ;;  %v3701_v15 = vld [vmem:[%s5031_s2 + $0x768] ss:$16 sps:$4 sm:$0xff]  }
  0xb7   :  { %1745 = vmatpush1.bf16.msra.mxu0 %v3614_v16  ;;  %1909 = vmatpush1.bf16.msra.mxu1 %v3617_v18  ;;  %v3706_v16 = vld [vmem:[%s5031_s2 + $0x784] ss:$16 sps:$4 sm:$0xff]   ;;  %v3709_v18 = vld [vmem:[%s5031_s2 + $0x78c] ss:$16 sps:$4 sm:$0xff]  }
  0xb8   :  { %1746 = vmatprep.subr.bf16.mxu0 %v3622_v19  ;;  %1910 = vmatprep.subr.bf16.mxu1 %v3625_v20  ;;  %v3704_v19 = vld [vmem:[%s5031_s2 + $0x780] ss:$16 sps:$4 sm:$0xff]   ;;  %v3707_v20 = vld [vmem:[%s5031_s2 + $0x788] ss:$16 sps:$4 sm:$0xff]  }
  0xbb   :  { %1747 = vmatpush1.bf16.msra.mxu0 %v3620_v22  ;;  %1911 = vmatpush1.bf16.msra.mxu1 %v3623_v23  ;;  %v3715_v22 = vld [vmem:[%s5031_s2 + $0x7ac] ss:$16 sps:$4 sm:$0xff]   ;;  %v3710_v23 = vld [vmem:[%s5031_s2 + $0x7a0] ss:$16 sps:$4 sm:$0xff]  }
  0xbc   :  { %1748 = vmatprep.subr.bf16.mxu0 %v3628_v24  ;;  %1912 = vmatprep.subr.bf16.mxu1 %v3631_v12  ;;  %v3713_v24 = vld [vmem:[%s5031_s2 + $0x7a8] ss:$16 sps:$4 sm:$0xff]   ;;  %v3718_v12 = vld [vmem:[%s5031_s2 + $0x7c4] ss:$16 sps:$4 sm:$0xff]  }
  0xbf   :  { %1749 = vmatpush1.bf16.msra.mxu0 %v3626_v26  ;;  %1913 = vmatpush1.bf16.msra.mxu1 %v3629_v9  ;;  %v3721_v26 = vld [vmem:[%s5031_s2 + $0x7cc] ss:$16 sps:$4 sm:$0xff]   ;;  %v3716_v9 = vld [vmem:[%s5031_s2 + $0x7c0] ss:$16 sps:$4 sm:$0xff]  }
  0xc0   :  { %1759 = vmatprep.subr.bf16.mxu0 %v3634_v27  ;;  %1923 = vmatprep.subr.bf16.mxu1 %v3637_v49  ;;  %v3719_v27 = vld [vmem:[%s5031_s2 + $0x7c8] ss:$16 sps:$4 sm:$0xff]   ;;  %v3724_v49 = vld [vmem:[%s5031_s2 + $0x7e4] ss:$16 sps:$4 sm:$0xff]  }
  0xc2   :  { %1751 = vmatmul.mubr.bf16.vlgmr.msra.gmra.mrb[0].mxu0 %v330_v31  ;;  %1915 = vmatmul.mubr.bf16.vlgmr.msra.gmra.mrb[0].mxu1 %v330_v31  ;;  %v3730_v31 = vld [vmem:[%s5033_s3 + $0x4] ss:$8 sps:$4 sm:$0xff]  }
  0xc3   :  { %1760 = vmatpush1.bf16.msra.mxu0 %v3632_v28  ;;  %1924 = vmatpush1.bf16.msra.mxu1 %v3635_v29  ;;  %v3727_v28 = vld [vmem:[%s5031_s2 + $0x7ec] ss:$16 sps:$4 sm:$0xff]   ;;  %v3722_v29 = vld [vmem:[%s5031_s2 + $0x7e0] ss:$16 sps:$4 sm:$0xff]  }
  0xc4   :  { %1761 = vmatprep.subr.bf16.mxu0 %v3640_v32  ;;  %1925 = vmatprep.subr.bf16.mxu1 %v3643_v33  ;;  %v332_v32 = vpack.c.bf16 %v4480_v25, %v4480_v25  ;;  %v3728_v33 = vld [vmem:[%s5033_s3] ss:$8 sps:$4 sm:$0xff]   ;;  %v3736_v25 = vld [vmem:[%s5033_s3 + $0x24] ss:$8 sps:$4 sm:$0xff]  }
  0xc5   :  { %1791 = vmatprep.mubr.bf16.mxu0 %v333_v35  ;;  %1955 = vmatprep.mubr.bf16.mxu1 %v333_v35  ;;  %v3734_v35 = vld [vmem:[%s5033_s3 + $0x20] ss:$8 sps:$4 sm:$0xff]  }
  0xc7   :  { %1762 = vmatpush1.bf16.msra.mxu0 %v3638_v34  ;;  %1926 = vmatpush1.bf16.msra.mxu1 %v3641_v17  ;;  %v3733_v34 = vld [vmem:[%s5033_s3 + $0x14] ss:$8 sps:$4 sm:$0xff]   ;;  %v3731_v17 = vld [vmem:[%s5033_s3 + $0x10] ss:$8 sps:$4 sm:$0xff]  }
  0xc8   :  { %1763 = vmatprep.subr.bf16.mxu0 %v3646_v36  ;;  %1927 = vmatprep.subr.bf16.mxu1 %v3649_v37  ;;  %v3739_v36 = vld [vmem:[%s5033_s3 + $0x34] ss:$8 sps:$4 sm:$0xff]   ;;  %v3737_v37 = vld [vmem:[%s5033_s3 + $0x30] ss:$8 sps:$4 sm:$0xff]  }
  0xcb   :  { %1764 = vmatpush1.bf16.msra.mxu0 %v3644_v38  ;;  %1928 = vmatpush1.bf16.msra.mxu1 %v3647_v39  ;;  %v3742_v38 = vld [vmem:[%s5033_s3 + $0x44] ss:$8 sps:$4 sm:$0xff]   ;;  %v3740_v39 = vld [vmem:[%s5033_s3 + $0x40] ss:$8 sps:$4 sm:$0xff]  }
  0xcc   :  { %1765 = vmatprep.subr.bf16.mxu0 %v3652_v40  ;;  %1929 = vmatprep.subr.bf16.mxu1 %v3655_v41  ;;  %v3745_v40 = vld [vmem:[%s5033_s3 + $0x54] ss:$8 sps:$4 sm:$0xff]   ;;  %v3743_v41 = vld [vmem:[%s5033_s3 + $0x50] ss:$8 sps:$4 sm:$0xff]  }
  0xcf   :  { %1766 = vmatpush1.bf16.msra.mxu0 %v3650_v42  ;;  %1930 = vmatpush1.bf16.msra.mxu1 %v3653_v44  ;;  %v3748_v42 = vld [vmem:[%s5033_s3 + $0x64] ss:$8 sps:$4 sm:$0xff]   ;;  %v3746_v44 = vld [vmem:[%s5033_s3 + $0x60] ss:$8 sps:$4 sm:$0xff]  }
  0xd0   :  { %1767 = vmatprep.subr.bf16.mxu0 %v3658_v45  ;;  %1931 = vmatprep.subr.bf16.mxu1 %v3661_v46  ;;  %v3751_v45 = vld [vmem:[%s5033_s3 + $0x74] ss:$8 sps:$4 sm:$0xff]   ;;  %v3749_v46 = vld [vmem:[%s5033_s3 + $0x70] ss:$8 sps:$4 sm:$0xff]  }
  0xd3   :  { %1768 = vmatpush1.bf16.msra.mxu0 %v3656_v47  ;;  %1932 = vmatpush1.bf16.msra.mxu1 %v3659_v48  ;;  %v3754_v47 = vld [vmem:[%s5033_s3 + $0x84] ss:$8 sps:$4 sm:$0xff]   ;;  %v3752_v48 = vld [vmem:[%s5033_s3 + $0x80] ss:$8 sps:$4 sm:$0xff]  }
  0xd4   :  { %1769 = vmatprep.subr.bf16.mxu0 %v3664_v50  ;;  %1933 = vmatprep.subr.bf16.mxu1 %v3667_v51  ;;  %v3757_v50 = vld [vmem:[%s5033_s3 + $0x94] ss:$8 sps:$4 sm:$0xff]   ;;  %v3755_v51 = vld [vmem:[%s5033_s3 + $0x90] ss:$8 sps:$4 sm:$0xff]  }
  0xd7   :  { %1770 = vmatpush1.bf16.msra.mxu0 %v3662_v52  ;;  %1934 = vmatpush1.bf16.msra.mxu1 %v3665_v53  ;;  %v3760_v52 = vld [vmem:[%s5033_s3 + $0xa4] ss:$8 sps:$4 sm:$0xff]   ;;  %v3758_v53 = vld [vmem:[%s5033_s3 + $0xa0] ss:$8 sps:$4 sm:$0xff]  }
  0xd8   :  { %1771 = vmatprep.subr.bf16.mxu0 %v3670_v54  ;;  %1935 = vmatprep.subr.bf16.mxu1 %v3673_v55  ;;  %v3763_v54 = vld [vmem:[%s5033_s3 + $0xb4] ss:$8 sps:$4 sm:$0xff]   ;;  %v3761_v55 = vld [vmem:[%s5033_s3 + $0xb0] ss:$8 sps:$4 sm:$0xff]  }
  0xdb   :  { %1772 = vmatpush1.bf16.msra.mxu0 %v3668_v56  ;;  %1936 = vmatpush1.bf16.msra.mxu1 %v3671_v57  ;;  %v3766_v56 = vld [vmem:[%s5033_s3 + $0xc4] ss:$8 sps:$4 sm:$0xff]   ;;  %v3764_v57 = vld [vmem:[%s5033_s3 + $0xc0] ss:$8 sps:$4 sm:$0xff]  }
  0xdc   :  { %1773 = vmatprep.subr.bf16.mxu0 %v3676_v58  ;;  %1937 = vmatprep.subr.bf16.mxu1 %v3679_v59  ;;  %v3769_v58 = vld [vmem:[%s5033_s3 + $0xd4] ss:$8 sps:$4 sm:$0xff]   ;;  %v3767_v59 = vld [vmem:[%s5033_s3 + $0xd0] ss:$8 sps:$4 sm:$0xff]  }
  0xdf   :  { %1774 = vmatpush1.bf16.msra.mxu0 %v3674_v60  ;;  %1938 = vmatpush1.bf16.msra.mxu1 %v3677_v61  ;;  %v3772_v60 = vld [vmem:[%s5033_s3 + $0xe4] ss:$8 sps:$4 sm:$0xff]   ;;  %v3770_v61 = vld [vmem:[%s5033_s3 + $0xe0] ss:$8 sps:$4 sm:$0xff]  }
  0xe0   :  { %1775 = vmatprep.subr.bf16.mxu0 %v3682_v62  ;;  %1939 = vmatprep.subr.bf16.mxu1 %v3685_v63  ;;  %v3775_v62 = vld [vmem:[%s5033_s3 + $0xf4] ss:$8 sps:$4 sm:$0xff]   ;;  %v3773_v63 = vld [vmem:[%s5033_s3 + $0xf0] ss:$8 sps:$4 sm:$0xff]  }
  0xe3   :  { %1776 = vmatpush1.bf16.msra.mxu0 %v3680_v0  ;;  %1940 = vmatpush1.bf16.msra.mxu1 %v3683_v1  ;;  %v3778_v0 = vld [vmem:[%s5033_s3 + $0x104] ss:$8 sps:$4 sm:$0xff]   ;;  %v3842_v1 = vmov 0  }
  0xe4   :  { %1777 = vmatprep.subr.bf16.mxu0 %v3688_v2  ;;  %1941 = vmatprep.subr.bf16.mxu1 %v3691_v3  ;;  %v3802_v2 = vld [vmem:[%s5034_s4] sm:$0xff]   ;;  %v3803_v3 = vld [vmem:[%s5034_s4 + $0x8] sm:$0xff]  }
  0xe7   :  { %1778 = vmatpush1.bf16.msra.mxu0 %v3686_v4  ;;  %1942 = vmatpush1.bf16.msra.mxu1 %v3689_v5  ;;  %v3804_v4 = vld [vmem:[%s5034_s4 + $0x10] sm:$0xff]   ;;  %v3805_v5 = vld [vmem:[%s5034_s4 + $0x18] sm:$0xff]  }
  0xe8   :  { %1779 = vmatprep.subr.bf16.mxu0 %v3694_v6  ;;  %1943 = vmatprep.subr.bf16.mxu1 %v3697_v7  ;;  %v3806_v6 = vld [vmem:[%s5034_s4 + $0x20] sm:$0xff]   ;;  %v3807_v7 = vld [vmem:[%s5034_s4 + $0x28] sm:$0xff]  }
  0xeb   :  { %1780 = vmatpush1.bf16.msra.mxu0 %v3692_v8  ;;  %1944 = vmatpush1.bf16.msra.mxu1 %v3695_v10  ;;  %v3808_v8 = vld [vmem:[%s5034_s4 + $0x30] sm:$0xff]   ;;  %v3809_v10 = vld [vmem:[%s5034_s4 + $0x38] sm:$0xff]  }
  0xec   :  { %1781 = vmatprep.subr.bf16.mxu0 %v3700_v11  ;;  %1945 = vmatprep.subr.bf16.mxu1 %v3703_v13  ;;  %v3810_v11 = vld [vmem:[%s5034_s4 + $0x40] sm:$0xff]   ;;  %v3811_v13 = vld [vmem:[%s5034_s4 + $0x48] sm:$0xff]  }
  0xef   :  { %1782 = vmatpush1.bf16.msra.mxu0 %v3698_v14  ;;  %1946 = vmatpush1.bf16.msra.mxu1 %v3701_v15  ;;  %v3812_v14 = vld [vmem:[%s5034_s4 + $0x50] sm:$0xff]   ;;  %v338_v15 = vsub.s32 0, %v3997_v43 }
  0xf0   :  { %1783 = vmatprep.subr.bf16.mxu0 %v3706_v16  ;;  %1947 = vmatprep.subr.bf16.mxu1 %v3709_v18  ;;  %v334_v16 = vld [vmem:[%s5035_s5] ss:$8 sm:$0xf]  ;;  %v342_v18 = vsub.s32 1, %v3997_v43 }
  0xf3   :  { %1784 = vmatpush1.bf16.msra.mxu0 %v3704_v19  ;;  %1948 = vmatpush1.bf16.msra.mxu1 %v3707_v20  ;;  %v350_v19 = vsub.s32 3, %v3997_v43  ;;  %v339_v20 = vrot.slane %v334_v16, %v338_v15 }
  0xf4   :  { %1785 = vmatprep.subr.bf16.mxu0 %v3712_v21  ;;  %1949 = vmatprep.subr.bf16.mxu1 %v3715_v22  ;;  %v343_v21 = vrot.slane %v334_v16, %v342_v18 }
  0xf5   :  { %v351_v22 = vrot.slane %v334_v16, %v350_v19 }
  0xf7   :  { %1786 = vmatpush1.bf16.msra.mxu0 %v3710_v23  ;;  %1950 = vmatpush1.bf16.msra.mxu1 %v3713_v24 }
  0xf8   :  { %1787 = vmatprep.subr.bf16.mxu0 %v3718_v12  ;;  %1951 = vmatprep.subr.bf16.mxu1 %v3721_v26 }
  0xfb   :  { %1788 = vmatpush1.bf16.msra.mxu0 %v3716_v9  ;;  %1952 = vmatpush1.bf16.msra.mxu1 %v3719_v27 }
  0xfc   :  { %1789 = vmatprep.subr.bf16.mxu0 %v3724_v49  ;;  %1953 = vmatprep.subr.bf16.mxu1 %v3727_v28 }
  0xff   :  { %1790 = vmatpush1.bf16.msra.mxu0 %v3722_v29  ;;  %1954 = vmatpush1.bf16.msra.mxu1 %v3725_v30 }
 0x100   :  { %2290 = vmatprep.subr.bf16.mxu0 %v3730_v31  ;;  %2484 = vmatprep.subr.bf16.mxu1 %v3842_v1 }
 0x102   :  { %1792 = vmatmul.mubr.bf16.vlgmr.msra.gmra.mrb[0].mxu0 %v332_v32  ;;  %1956 = vmatmul.mubr.bf16.vlgmr.msra.gmra.mrb[0].mxu1 %v332_v32 }
 0x103   :  { %2291 = vmatpush1.bf16.msra.mxu0 %v3728_v33  ;;  %2485 = vmatpush1.bf16.msra.mxu1 %v3802_v2  ;;  %v3126_v2 = vld [vmem:[%s5035_s5 + $0x1] ss:$8 sm:$0x3] }
 0x104   :  { %2292 = vmatprep.subr.bf16.mxu0 %v3733_v34  ;;  %2486 = vmatprep.subr.bf16.mxu1 %v3842_v1 }
 0x107   :  { %2293 = vmatpush1.bf16.msra.mxu0 %v3731_v17  ;;  %2487 = vmatpush1.bf16.msra.mxu1 %v3803_v3  ;;  %v2027_v3 = vrot.slane %v3126_v2, %v338_v15  ;;  %v2401_v15 = vld [vmem:[%s5035_s5 + $0x2] ss:$0 sm:$0xff] }
 0x108   :  { %2294 = vmatprep.subr.bf16.mxu0 %v3736_v25  ;;  %2488 = vmatprep.subr.bf16.mxu1 %v3842_v1  ;;  %v3776_v25 = vld [vmem:[%s5033_s3 + $0x100] ss:$8 sps:$4 sm:$0xff]  }
 0x10b   :  { %2295 = vmatpush1.bf16.msra.mxu0 %v3734_v35  ;;  %2489 = vmatpush1.bf16.msra.mxu1 %v3804_v4  ;;  %v2031_v4 = vrot.slane %v3126_v2, %v342_v18 }
 0x10c   :  { %2296 = vmatprep.subr.bf16.mxu0 %v3739_v36  ;;  %2490 = vmatprep.subr.bf16.mxu1 %v3842_v1  ;;  %v3781_v36 = vld [vmem:[%s5033_s3 + $0x114] ss:$8 sps:$4 sm:$0xff]  }
 0x10f   :  { %2297 = vmatpush1.bf16.msra.mxu0 %v3737_v37  ;;  %2491 = vmatpush1.bf16.msra.mxu1 %v3805_v5 }
 0x110   :  { %2298 = vmatprep.subr.bf16.mxu0 %v3742_v38  ;;  %2492 = vmatprep.subr.bf16.mxu1 %v3842_v1  ;;  %v3779_v38 = vld [vmem:[%s5033_s3 + $0x110] ss:$8 sps:$4 sm:$0xff]  }
 0x113   :  { %2299 = vmatpush1.bf16.msra.mxu0 %v3740_v39  ;;  %2493 = vmatpush1.bf16.msra.mxu1 %v3806_v6  ;;  %v3784_v39 = vld [vmem:[%s5033_s3 + $0x124] ss:$8 sps:$4 sm:$0xff]  }
 0x114   :  { %2300 = vmatprep.subr.bf16.mxu0 %v3745_v40  ;;  %2494 = vmatprep.subr.bf16.mxu1 %v3842_v1  ;;  %v3782_v40 = vld [vmem:[%s5033_s3 + $0x120] ss:$8 sps:$4 sm:$0xff]  }
 0x117   :  { %2301 = vmatpush1.bf16.msra.mxu0 %v3743_v41  ;;  %2495 = vmatpush1.bf16.msra.mxu1 %v3807_v7  ;;  %v3787_v41 = vld [vmem:[%s5033_s3 + $0x134] ss:$8 sps:$4 sm:$0xff]  }
 0x118   :  { %2302 = vmatprep.subr.bf16.mxu0 %v3748_v42  ;;  %2496 = vmatprep.subr.bf16.mxu1 %v3842_v1  ;;  %v3785_v42 = vld [vmem:[%s5033_s3 + $0x130] ss:$8 sps:$4 sm:$0xff]  }
 0x11b   :  { %2303 = vmatpush1.bf16.msra.mxu0 %v3746_v44  ;;  %2497 = vmatpush1.bf16.msra.mxu1 %v3808_v8  ;;  %v3790_v44 = vld [vmem:[%s5033_s3 + $0x144] ss:$8 sps:$4 sm:$0xff]  }
 0x11c   :  { %2304 = vmatprep.subr.bf16.mxu0 %v3751_v45  ;;  %2498 = vmatprep.subr.bf16.mxu1 %v3842_v1  ;;  %v3788_v45 = vld [vmem:[%s5033_s3 + $0x140] ss:$8 sps:$4 sm:$0xff]  }
 0x11f   :  { %2305 = vmatpush1.bf16.msra.mxu0 %v3749_v46  ;;  %2499 = vmatpush1.bf16.msra.mxu1 %v3809_v10  ;;  %v3793_v46 = vld [vmem:[%s5033_s3 + $0x154] ss:$8 sps:$4 sm:$0xff]  }
 0x120   :  { %2306 = vmatprep.subr.bf16.mxu0 %v3754_v47  ;;  %2500 = vmatprep.subr.bf16.mxu1 %v3842_v1  ;;  %v3791_v47 = vld [vmem:[%s5033_s3 + $0x150] ss:$8 sps:$4 sm:$0xff]  }
 0x123   :  { %2307 = vmatpush1.bf16.msra.mxu0 %v3752_v48  ;;  %2501 = vmatpush1.bf16.msra.mxu1 %v3810_v11  ;;  %v346_v48 = vsub.s32 2, %v3997_v43 }
 0x124   :  { %2308 = vmatprep.subr.bf16.mxu0 %v3757_v50  ;;  %2502 = vmatprep.subr.bf16.mxu1 %v3842_v1  ;;  %v3796_v50 = vld [vmem:[%s5033_s3 + $0x164] ss:$8 sps:$4 sm:$0xff]  }
 0x127   :  { %2309 = vmatpush1.bf16.msra.mxu0 %v3755_v51  ;;  %2503 = vmatpush1.bf16.msra.mxu1 %v3811_v13  ;;  %v3794_v51 = vld [vmem:[%s5033_s3 + $0x160] ss:$8 sps:$4 sm:$0xff]  }
 0x128   :  { %2310 = vmatprep.subr.bf16.mxu0 %v3760_v52  ;;  %2504 = vmatprep.subr.bf16.mxu1 %v3842_v1  ;;  %v347_v52 = vrot.slane %v334_v16, %v346_v48  ;;  %v3825_v48 = vld [vmem:[%s5034_s4 + $0xb4] sm:$0xff]  }
 0x12b   :  { %2311 = vmatpush1.bf16.msra.mxu0 %v3758_v53  ;;  %2505 = vmatpush1.bf16.msra.mxu1 %v3812_v14  ;;  %v3799_v53 = vld [vmem:[%s5033_s3 + $0x174] ss:$8 sps:$4 sm:$0xff]  }
 0x12c   :  { %2312 = vmatprep.subr.bf16.mxu0 %v3763_v54  ;;  %2506 = vmatprep.subr.bf16.mxu1 %v3842_v1  ;;  %v2016_v54 = vld [vmem:[%s5033_s3 + $0x180] sm:$0xff] }
 0x12f   :  { %2313 = vmatpush1.bf16.msra.mxu0 %v3761_v55  ;;  %v3797_v55 = vld [vmem:[%s5033_s3 + $0x170] ss:$8 sps:$4 sm:$0xff]  }
 0x130   :  { %2314 = vmatprep.subr.bf16.mxu0 %v3766_v56 }
 0x133   :  { %2315 = vmatpush1.bf16.msra.mxu0 %v3764_v57  ;;  %v3176_v57 = vcombine.high %v2016_v54, %v2016_v54 }
 0x134   :  { %2316 = vmatprep.subr.bf16.mxu0 %v3769_v58  ;;  %v3175_v58 = vcombine.low %v2016_v54, %v2016_v54  ;;  %v3830_v54 = vld [vmem:[%s5034_s4 + $0xdc] sm:$0xff]  }
 0x137   :  { %2317 = vmatpush1.bf16.msra.mxu0 %v3767_v59 }
 0x138   :  { %2318 = vmatprep.subr.bf16.mxu0 %v3772_v60  ;;  %v2285_v60 = vsel %vm2283_vm1, %v3175_v58, 0  ;;  %v3834_v58 = vld [vmem:[%s5034_s4 + $0xfc] sm:$0xff]  }
 0x13b   :  { %2319 = vmatpush1.bf16.msra.mxu0 %v3770_v61 }
 0x13c   :  { %2320 = vmatprep.subr.bf16.mxu0 %v3775_v62  ;;  %v3813_v62 = vld [vmem:[%s5034_s4 + $0x58] sm:$0xff]  }
 0x13d   :  { %2507 = vmatpush1.bf16.msra.mxu1 %v3813_v62 }
 0x13e   :  { %2508 = vmatprep.subr.bf16.mxu1 %v3842_v1 }
 0x13f   :  { %2321 = vmatpush1.bf16.msra.mxu0 %v3773_v63  ;;  %v3814_v63 = vld [vmem:[%s5034_s4 + $0x60] ss:$0 sps:$4 sm:$0xff]  }
 0x140   :  { %2331 = vmatprep.subr.bf16.mxu0 %v3778_v0  ;;  %v2482_v0 = vsel %vm2283_vm1, %v3814_v63, 0 }
 0x141   :  { %2509 = vmatpush1.bf16.msra.mxu1 %v2482_v0 }
 0x1d5   :  { %v1793_v23 = vpop.f32.mrb[0].mxu0  ;;  %v1957_v24 = vpop.f32.mrb[0].mxu1 }
 0x1d6   :  { %v3304_v12 = vadd.f32 %v1793_v23, %v339_v20  ;;  %v1795_v26 = vpop.f32.mrb[1].mxu0  ;;  %v1959_v9 = vpop.f32.mrb[1].mxu1  ;;  %v3306_v56 = vadd.f32 %v1957_v24, %v347_v52  ;;  %v3815_v23 = vld [vmem:[%s5034_s4 + $0x64] sm:$0xff]   ;;  %v3843_v24 = vmov 0.0   ;;  %v3828_v52 = vld [vmem:[%s5034_s4 + $0xcc] sm:$0xff]  }
 0x1d7   :  { %v3305_v27 = vadd.f32 %v1795_v26, %v343_v21  ;;  %v3307_v49 = vadd.f32 %v1959_v9, %v351_v22  ;;  %v1797_v28 = vpop.f32.mrb[2].mxu0  ;;  %v1961_v29 = vpop.f32.mrb[2].mxu1  ;;  %3244 = vmatprep.subr.bf16.mxu1 %v3843_v24 }
 0x1d8   :  { %v1964_v30 = vmax.f32 %v3304_v12, 0.0  ;;  %v1798_v31 = vpop.f32.mrb[3].mxu0  ;;  %v1962_v32 = vpop.f32.mrb[3].mxu1  ;;  %v1966_v59 = vmax.f32 %v3306_v56, 0.0  ;;  %v3816_v12 = vld [vmem:[%s5034_s4 + $0x6c] sm:$0xff]   ;;  %v3817_v29 = vld [vmem:[%s5034_s4 + $0x74] sm:$0xff]  }
 0x1d9   :  { %v1965_v33 = vmax.f32 %v3305_v27, 0.0  ;;  %v1967_v34 = vmax.f32 %v3307_v49, 0.0  ;;  %v3819_v31 = vld [vmem:[%s5034_s4 + $0x84] sm:$0xff]   ;;  %v3820_v32 = vld [vmem:[%s5034_s4 + $0x8c] sm:$0xff]  }
 0x1da   :  { %v2017_v35 = vpack.c.bf16 %v1964_v30, %v1964_v30  ;;  %v2019_v61 = vpack.c.bf16 %v1966_v59, %v1966_v59  ;;  %v3818_v30 = vld [vmem:[%s5034_s4 + $0x7c] sm:$0xff]   ;;  %v3832_v56 = vld [vmem:[%s5034_s4 + $0xec] sm:$0xff]   ;;  %v3835_v59 = vld [vmem:[%s5034_s4 + $0x104] sm:$0xff]  }
 0x1db   :  { %v2018_v17 = vpack.c.bf16 %v1965_v33, %v1965_v33  ;;  %v2020_v37 = vpack.c.bf16 %v1967_v34, %v1967_v34  ;;  %v3821_v33 = vld [vmem:[%s5034_s4 + $0x94] sm:$0xff]   ;;  %v3822_v34 = vld [vmem:[%s5034_s4 + $0x9c] sm:$0xff]  }
 0x1dd   :  { %2322 = vmatprep.mubr.bf16.mxu0 %v2018_v17 }
 0x1de   :  { %2323 = vmatmul.mubr.bf16.vlgmr.msra.gmra.mrb[4].mxu0 %v2017_v35 }
 0x1df   :  { %2332 = vmatpush1.bf16.msra.mxu0 %v3776_v25  ;;  %3178 = vmatprep.mubr.msk.bf16.mxu0 %vm2279_vm0, %v2020_v37  ;;  %v2539_v37 = vld [vmem:[%s5035_s5 + $0x3] ss:$0 sm:$0xff] }
 0x1e0   :  { %2333 = vmatprep.subr.bf16.mxu0 %v3781_v36 }
 0x1e3   :  { %2334 = vmatpush1.bf16.msra.mxu0 %v3779_v38 }
 0x1e4   :  { %2335 = vmatprep.subr.bf16.mxu0 %v3784_v39  ;;  %v2541_v39 = vld [vmem:[%s5035_s5 + $0x4] ss:$0 sm:$0xff] }
 0x1e7   :  { %2336 = vmatpush1.bf16.msra.mxu0 %v3782_v40 }
 0x1e8   :  { %2337 = vmatprep.subr.bf16.mxu0 %v3787_v41  ;;  %v2543_v41 = vld [vmem:[%s5036_s1] sm:$0x3] }
 0x1eb   :  { %2338 = vmatpush1.bf16.msra.mxu0 %v3785_v42 }
 0x1ec   :  { %2339 = vmatprep.subr.bf16.mxu0 %v3790_v44 }
 0x1ef   :  { %2340 = vmatpush1.bf16.msra.mxu0 %v3788_v45  ;;  %v3823_v45 = vld [vmem:[%s5034_s4 + $0xa4] sm:$0xff]  }
 0x1f0   :  { %2341 = vmatprep.subr.bf16.mxu0 %v3793_v46 }
 0x1f3   :  { %2342 = vmatpush1.bf16.msra.mxu0 %v3791_v47  ;;  %v3824_v47 = vld [vmem:[%s5034_s4 + $0xac] sm:$0xff]  }
 0x1f4   :  { %2343 = vmatprep.subr.bf16.mxu0 %v3796_v50  ;;  %v3826_v50 = vld [vmem:[%s5034_s4 + $0xbc] sm:$0xff]  }
 0x1f7   :  { %2344 = vmatpush1.bf16.msra.mxu0 %v3794_v51  ;;  %v3827_v51 = vld [vmem:[%s5034_s4 + $0xc4] sm:$0xff]  }
 0x1f8   :  { %2345 = vmatprep.subr.bf16.mxu0 %v3799_v53  ;;  %v3829_v53 = vld [vmem:[%s5034_s4 + $0xd4] sm:$0xff]  }
 0x1fb   :  { %2346 = vmatpush1.bf16.msra.mxu0 %v3797_v55  ;;  %v3831_v55 = vld [vmem:[%s5034_s4 + $0xe4] sm:$0xff]  }
 0x1fc   :  { %3177 = vmatprep.subr.msk.bf16.mxu0 %vm2283_vm1, %v3176_v57  ;;  %v3833_v57 = vld [vmem:[%s5034_s4 + $0xf4] sm:$0xff]  }
 0x1ff   :  { %2348 = vmatpush1.bf16.msra.mxu0 %v2285_v60  ;;  %v3836_v60 = vld [vmem:[%s5034_s4 + $0x10c] sm:$0xff]  }
 0x200   :  { %3284 = vmatprep.subr.bf16.mxu0 %v3843_v24 }
 0x202   :  { %2364 = vmatmul.mubr.bf16.vlgmr.msra.gmra.mrb[4].mxu0 %v2019_v61  ;;  %v2562_v61 = vld [vmem:[%s5035_s5 + $0x5] ss:$0 sm:$0xff] }
 0x203   :  { %3300 = vmatprep.mubr.msk.bf16.mxu0 %vm3844_vm4, %v3843_v24  ;;  %3285 = vmatpush3.bf16.msra.mxu0 %v3831_v55 }
 0x204   :  { %3286 = vmatprep.subr.bf16.mxu0 %v3843_v24 }
 0x207   :  { %3287 = vmatpush3.bf16.msra.mxu0 %v3832_v56 }
 0x208   :  { %3288 = vmatprep.subr.bf16.mxu0 %v3843_v24 }
 0x20b   :  { %3289 = vmatpush3.bf16.msra.mxu0 %v3833_v57 }
 0x20c   :  { %3290 = vmatprep.subr.bf16.mxu0 %v3843_v24 }
 0x20f   :  { %3291 = vmatpush3.bf16.msra.mxu0 %v3834_v58 }
 0x210   :  { %3292 = vmatprep.subr.bf16.mxu0 %v3843_v24 }
 0x213   :  { %3293 = vmatpush3.bf16.msra.mxu0 %v3835_v59 }
 0x214   :  { %3294 = vmatprep.subr.bf16.mxu0 %v3843_v24 }
 0x217   :  { %3295 = vmatpush3.bf16.msra.mxu0 %v3836_v60 }
 0x218   :  { %3296 = vmatprep.subr.bf16.mxu0 %v3843_v24 }
 0x2d5   :  { %v2365_v5 = vpop.f32.mrb[4].mxu0 }
 0x2d6   :  { %v3308_v6 = vadd.f32 %v2365_v5, %v2027_v3  ;;  %v2367_v7 = vpop.f32.mrb[5].mxu0 }
 0x2d7   :  { %v3309_v1 = vadd.f32 %v2367_v7, %v2031_v4  ;;  %v2369_v8 = vpop.f32.mrb[6].mxu0  ;;  %v3838_v7 = vld [vmem:[%s5034_s4 + $0x11c] sm:$0xff]  }
 0x2d8   :  { %v2372_v10 = vmax.f32 %v3308_v6, 0.0  ;;  %v2370_v11 = vpop.f32.mrb[7].mxu0  ;;  %v3837_v6 = vld [vmem:[%s5034_s4 + $0x114] sm:$0xff]  }
 0x2d9   :  { %v2373_v13 = vmax.f32 %v3309_v1, 0.0  ;;  %3297 = vmatpush3.bf16.msra.mxu0 %v3837_v6  ;;  %v2669_v1 = vld [vmem:[%s5035_s5 + $0x6] ss:$0 sm:$0xff] }
 0x2da   :  { %v2399_v16 = vpack.c.bf16 %v2372_v10, %v2372_v10  ;;  %3298 = vmatprep.subr.bf16.mxu0 %v3843_v24 }
 0x2db   :  { %v2400_v14 = vpack.c.bf16 %v2373_v13, %v2373_v13 }
 0x2dd   :  { %3192 = vmatprep.mubr.msk.bf16.mxu1 %vm2477_vm2, %v2400_v14  ;;  %3299 = vmatpush3.bf16.msra.mxu0 %v3838_v7 }
 0x2de   :  { %2517 = vmatmul.mubr.bf16.vlgmr.msra.gmra.mrb[4].mxu1 %v2399_v16 }
 0x2df   :  { %3245 = vmatpush3.bf16.msra.mxu1 %v3815_v23  ;;  %3260 = vmatprep.mubr.msk.bf16.mxu1 %vm3844_vm4, %v3843_v24 }
 0x2e0   :  { %3246 = vmatprep.subr.bf16.mxu1 %v3843_v24 }
 0x2e3   :  { %3247 = vmatpush3.bf16.msra.mxu1 %v3816_v12 }
 0x2e4   :  { %3248 = vmatprep.subr.bf16.mxu1 %v3843_v24 }
 0x2e7   :  { %3249 = vmatpush3.bf16.msra.mxu1 %v3817_v29 }
 0x2e8   :  { %3250 = vmatprep.subr.bf16.mxu1 %v3843_v24 }
 0x2eb   :  { %3251 = vmatpush3.bf16.msra.mxu1 %v3818_v30 }
 0x2ec   :  { %3252 = vmatprep.subr.bf16.mxu1 %v3843_v24 }
 0x2ef   :  { %3253 = vmatpush3.bf16.msra.mxu1 %v3819_v31 }
 0x2f0   :  { %3254 = vmatprep.subr.bf16.mxu1 %v3843_v24 }
 0x2f3   :  { %3255 = vmatpush3.bf16.msra.mxu1 %v3820_v32 }
 0x2f4   :  { %3256 = vmatprep.subr.bf16.mxu1 %v3843_v24 }
 0x2f7   :  { %3257 = vmatpush3.bf16.msra.mxu1 %v3821_v33 }
 0x2f8   :  { %3258 = vmatprep.subr.bf16.mxu1 %v3843_v24 }
 0x2fb   :  { %3259 = vmatpush3.bf16.msra.mxu1 %v3822_v34 }
 0x2fc   :  { %3264 = vmatprep.subr.bf16.mxu1 %v3843_v24 }
 0x3b1   :  { %v2518_v19 = vpop.f32.mrb[4].mxu1 }
 0x3b2   :  { %v2519_v43 = vadd.f32 %v2518_v19, %v2401_v15  ;;  %v2520_v18 = vpop.f32.mrb[5].mxu1  ;;  %v2776_v19 = vld [vmem:[%s5035_s5 + $0x7] ss:$0 sm:$0xff] }
 0x3b3   :  { %v2521_v20 = vpop.f32.mrb[6].mxu1 }
 0x3b4   :  { %v2522_v21 = vpop.f32.mrb[7].mxu1  ;;  %v2525_v22 = vsel %vm2524_vm3, %v2519_v43, 0.0 }
 0x3b5   :  { %2526 = vadd.xlane.f32.xlu0 %v2525_v22 }
 0x442   :  { %v2527_v26 = vpop.xlane.xlu0 %2526 }
 0x443   :  { %v2529_v9 = vmul.f32 0.03125, %v2527_v26 }
 0x445   :  { %v2530_v27 = vsub.f32 %v2519_v43, %v2529_v9 }
 0x447   :  { %v2531_v49 = vmul.f32 %v2530_v27, %v2530_v27 }
 0x449   :  { %v2532_v28 = vsel %vm2524_vm3, %v2531_v49, 0.0 }
 0x44a   :  { %2533 = vadd.xlane.f32.xlu0 %v2532_v28 }
 0x4d7   :  { %v2534_v17 = vpop.xlane.xlu0 %2533 }
 0x4d8   :  { %v2535_v25 = vmul.f32 0.03125, %v2534_v17 }
 0x4da   :  { %v2536_v35 = vadd.f32 1e-05, %v2535_v25 }
 0x4dc   :  { %3839 = vrsqrt.f32 %v2536_v35 }
 0x4e6   :  { %v3840_v36 = vpop.eup %3839 }
 0x4e7   :  { %v2538_v38 = vmul.f32 %v3840_v36, %v2530_v27 }
 0x4e9   :  { %v2540_v40 = vmul.f32 %v2539_v37, %v2538_v38 }
 0x4eb   :  { %v2542_v42 = vadd.f32 %v2541_v39, %v2540_v40 }
 0x4ed   :  { %v2544_v44 = vadd.f32 %v2543_v41, %v2542_v42 }
 0x4ef   :  { %v2561_v46 = vpack.c.bf16 %v2544_v44, %v2544_v44 }
 0x4f1   :  { %3261 = vmatmul.mubr.bf16.vlgmr.msra.gmra.mrb[8].mxu1 %v2561_v46 }
 0x4f2   :  { %3265 = vmatpush3.bf16.msra.mxu1 %v3823_v45  ;;  %3280 = vmatprep.mubr.msk.bf16.mxu1 %vm3844_vm4, %v3843_v24 }
 0x4f3   :  { %3266 = vmatprep.subr.bf16.mxu1 %v3843_v24 }
 0x4f6   :  { %3267 = vmatpush3.bf16.msra.mxu1 %v3824_v47 }
 0x4f7   :  { %3268 = vmatprep.subr.bf16.mxu1 %v3843_v24 }
 0x4fa   :  { %3269 = vmatpush3.bf16.msra.mxu1 %v3825_v48 }
 0x4fb   :  { %3270 = vmatprep.subr.bf16.mxu1 %v3843_v24 }
 0x4fe   :  { %3271 = vmatpush3.bf16.msra.mxu1 %v3826_v50 }
 0x4ff   :  { %3272 = vmatprep.subr.bf16.mxu1 %v3843_v24 }
 0x502   :  { %3273 = vmatpush3.bf16.msra.mxu1 %v3827_v51 }
 0x503   :  { %3274 = vmatprep.subr.bf16.mxu1 %v3843_v24 }
 0x506   :  { %3275 = vmatpush3.bf16.msra.mxu1 %v3828_v52 }
 0x507   :  { %3276 = vmatprep.subr.bf16.mxu1 %v3843_v24 }
 0x50a   :  { %3277 = vmatpush3.bf16.msra.mxu1 %v3829_v53 }
 0x50b   :  { %3278 = vmatprep.subr.bf16.mxu1 %v3843_v24 }
 0x50e   :  { %3279 = vmatpush3.bf16.msra.mxu1 %v3830_v54 }
 0x5c4   :  { %v2645_v62 = vpop.f32.mrb[8].mxu1 }
 0x5c5   :  { %v2646_v63 = vadd.f32 %v2645_v62, %v2562_v61  ;;  %v3262_v0 = vpop.f32.mrb[9].mxu1 }
 0x5c6   :  { %v2648_v2 = vpop.f32.mrb[10].mxu1 }
 0x5c7   :  { %v2651_v3 = vmax.f32 %v2646_v63, 0.0  ;;  %v3263_v4 = vpop.f32.mrb[11].mxu1 }
 0x5c9   :  { %v2668_v5 = vpack.c.bf16 %v2651_v3, %v2651_v3 }
 0x5cb   :  { %3281 = vmatmul.mubr.bf16.vlgmr.msra.gmra.mrb[12].mxu1 %v2668_v5 }
 0x69e   :  { %v2752_v8 = vpop.f32.mrb[12].mxu1 }
 0x69f   :  { %v2753_v10 = vadd.f32 %v2752_v8, %v2669_v1  ;;  %v3282_v11 = vpop.f32.mrb[13].mxu1 }
 0x6a0   :  { %v2755_v13 = vpop.f32.mrb[14].mxu1 }
 0x6a1   :  { %v2758_v14 = vmax.f32 %v2753_v10, 0.0  ;;  %v3283_v16 = vpop.f32.mrb[15].mxu1 }
 0x6a3   :  { %v2775_v15 = vpack.c.bf16 %v2758_v14, %v2758_v14 }
 0x6a5   :  { %3301 = vmatmul.mubr.bf16.vlgmr.msra.gmra.mrb[8].mxu0 %v2775_v15 }
 0x778   :  { %v2859_v43 = vpop.f32.mrb[8].mxu0 }
 0x779   :  { %v2860_v18 = vadd.f32 %v2859_v43, %v2776_v19  ;;  %v3302_v20 = vpop.f32.mrb[9].mxu0 }
 0x77a   :  { %v2862_v21 = vpop.f32.mrb[10].mxu0 }
 0x77b   :  { %2865 = vst [vmem:[%s5037_s6] sm:$0x3] %v2860_v18  ;;  %v3303_v22 = vpop.f32.mrb[11].mxu0 }

</bundles_post_ra>
